<compile_context>
chip_gen: v7x
topology: tpu7x:2x2x1
jax: 0.10.0
libtpu: 0.0.40
codegen_flags: <defaults>
</compile_context>

<pallas_src>
import functools

import jax
import jax.numpy as jnp
from jax import lax
from jax.experimental import pallas as pl
from jax.experimental.pallas import tpu as pltpu


def _round_up(v, m):
    return ((v + m - 1) // m) * m


def _pick_row_tile(h_out, w_out, p):
    """Largest divisor `th` of h_out such that the per-point one-hot matrix
    (th*w_out, p) f32 plus its iota stays within ~8 MiB."""
    max_rows = max(w_out, (8 * 1024 * 1024) // (8 * max(p, 1)))
    best = 1
    for th in range(1, h_out + 1):
        if h_out % th == 0 and th * w_out <= max_rows:
            best = th
    return best


# --------------------------------------------------------------------------- #
# Stage 1: conv_offset (3x3, padding 1) as 9 shifted-slice matmuls per batch.  #
# --------------------------------------------------------------------------- #
def _offset_conv_kernel(xp_ref, w_ref, b_ref, out_ref, *, H, W):
    # xp_ref : (H+2, W+2, C)   zero-padded input image, channels last
    # w_ref  : (9, C, OFFPAD)  per-tap weights, zero-padded in the output dim
    # b_ref  : (1, OFFPAD)     zero-padded bias
    # out_ref: (H, W, OFFPAD)
    C = xp_ref.shape[-1]
    OFFPAD = out_ref.shape[-1]
    x = xp_ref[...]
    wv = w_ref[...]
    acc = jnp.zeros((H * W, OFFPAD), jnp.float32)
    for kr in range(3):
        for kc in range(3):
            patch = x[kr:kr + H, kc:kc + W, :].reshape(H * W, C)
            acc = acc + jnp.dot(patch, wv[kr * 3 + kc],
                                preferred_element_type=jnp.float32)
    out_ref[...] = (acc + b_ref[...]).reshape(H, W, OFFPAD)


# --------------------------------------------------------------------------- #
# Stage 2: deformable bilinear sampling + final ks-stride-ks conv.             #
# --------------------------------------------------------------------------- #
def _deform_kernel(off_ref, x_ref, w_ref, out_ref, *, Hp, Wp, stride, ks, N):
    # off_ref: (TH, WO, OFFPAD)  offsets (lanes 0..N-1 = rows, N..2N-1 = cols)
    # x_ref  : (P, C)            zero-padded image, spatially flattened, ch. last
    # w_ref  : (N, C, OUTC_PAD)  final conv weight per kernel point, lane padded
    # out_ref: (TH, WO, OUTC_PAD)
    TH, WO, OUTC_PAD = out_ref.shape
    P, C = x_ref.shape
    T = TH * WO
    t = pl.program_id(1)
    half = float((ks - 1) // 2)
    ks_f = float(ks)

    off = off_ref[...]
    off_r = off[:, :, :N]            # (TH, WO, N)
    off_c = off[:, :, N:2 * N]

    # p0 (base sampling positions) and pn (kernel-point offsets), fused in-kernel.
    h_idx = lax.broadcasted_iota(jnp.int32, (TH, WO, 1), 0) + t * TH
    w_idx = lax.broadcasted_iota(jnp.int32, (TH, WO, 1), 1)
    base_r = (h_idx * stride + 1).astype(jnp.float32)
    base_c = (w_idx * stride + 1).astype(jnp.float32)

    n_f = lax.broadcasted_iota(jnp.int32, (1, 1, N), 2).astype(jnp.float32)
    pn_r = jnp.floor(n_f / ks_f) - half
    pn_c = (n_f - jnp.floor(n_f / ks_f) * ks_f) - half

    p_r = (base_r + pn_r + off_r).reshape(T, N)
    p_c = (base_c + pn_c + off_c).reshape(T, N)

    fr = jnp.floor(p_r)
    fc = jnp.floor(p_c)
    q_lt_r = jnp.clip(fr, 0.0, Hp - 1.0)
    q_lt_c = jnp.clip(fc, 0.0, Wp - 1.0)
    q_rb_r = jnp.clip(fr + 1.0, 0.0, Hp - 1.0)
    q_rb_c = jnp.clip(fc + 1.0, 0.0, Wp - 1.0)
    pr = jnp.clip(p_r, 0.0, Hp - 1.0)
    pc = jnp.clip(p_c, 0.0, Wp - 1.0)

    # bilinear weights, exactly as in the PyTorch module (clamped q, clamped p)
    g_lt = (1.0 + (q_lt_r - pr)) * (1.0 + (q_lt_c - pc))
    g_rb = (1.0 - (q_rb_r - pr)) * (1.0 - (q_rb_c - pc))
    g_lb = (1.0 + (q_lt_r - pr)) * (1.0 - (q_rb_c - pc))
    g_rt = (1.0 - (q_rb_r - pr)) * (1.0 + (q_lt_c - pc))

    i_lt = (q_lt_r * Wp + q_lt_c).astype(jnp.int32)   # (T, N)
    i_rb = (q_rb_r * Wp + q_rb_c).astype(jnp.int32)
    i_lb = (q_lt_r * Wp + q_rb_c).astype(jnp.int32)
    i_rt = (q_rb_r * Wp + q_lt_c).astype(jnp.int32)

    xv = x_ref[...]                                   # (P, C)
    wv = w_ref[...]                                   # (N, C, OUTC_PAD)
    cols = lax.broadcasted_iota(jnp.int32, (T, P), 1)

    acc = jnp.zeros((T, OUTC_PAD), jnp.float32)
    for n in range(N):
        # one-hot gather matrix for kernel point n (4 non-zeros per row)
        s_n = (jnp.where(cols == i_lt[:, n:n + 1], g_lt[:, n:n + 1], 0.0)
               + jnp.where(cols == i_rb[:, n:n + 1], g_rb[:, n:n + 1], 0.0)
               + jnp.where(cols == i_lb[:, n:n + 1], g_lb[:, n:n + 1], 0.0)
               + jnp.where(cols == i_rt[:, n:n + 1], g_rt[:, n:n + 1], 0.0))
        xq_n = jnp.dot(s_n, xv, preferred_element_type=jnp.float32)      # (T, C)
        acc = acc + jnp.dot(xq_n, wv[n], preferred_element_type=jnp.float32)

    out_ref[...] = acc.reshape(TH, WO, OUTC_PAD)


# --------------------------------------------------------------------------- #
# Wrapper                                                                      #
# --------------------------------------------------------------------------- #
def deform_conv2d(x, w_off, b_off, w_conv, *, kernel_size=3, padding=1, stride=1):
    """x: (B, C, H, W) f32; w_off: (2N, C, 3, 3); b_off: (2N,); w_conv: (outc, C, ks, ks)."""
    B, C, H, W = x.shape
    ks = kernel_size
    N = ks * ks
    outc = w_conv.shape[0]
    OFFPAD = _round_up(2 * N, 128)
    OUTC_PAD = _round_up(outc, 128)
    VMEM_LIMIT = 48 * 1024 * 1024

    x_nhwc = jnp.transpose(x, (0, 2, 3, 1)).astype(jnp.float32)         # (B, H, W, C)

    # ---- stage 1: conv_offset, computed at stride 1 (subsampled below for stride>1)
    xp1 = jnp.pad(x_nhwc, ((0, 0), (1, 1), (1, 1), (0, 0)))             # (B, H+2, W+2, C)
    w_taps = jnp.transpose(w_off, (2, 3, 1, 0)).reshape(9, C, 2 * N)
    w_taps = jnp.pad(w_taps, ((0, 0), (0, 0), (0, OFFPAD - 2 * N))).astype(jnp.float32)
    b_pad = jnp.pad(b_off.astype(jnp.float32), (0, OFFPAD - 2 * N)).reshape(1, OFFPAD)

    offset_cost = pl.CostEstimate(
        flops=2 * B * H * W * C * 9 * OFFPAD,
        transcendentals=0,
        bytes_accessed=4 * (B * (H + 2) * (W + 2) * C
                            + 9 * C * OFFPAD + OFFPAD + B * H * W * OFFPAD))

    offsets = pl.pallas_call(
        functools.partial(_offset_conv_kernel, H=H, W=W),
        out_shape=jax.ShapeDtypeStruct((B, H, W, OFFPAD), jnp.float32),
        grid=(B,),
        in_specs=[
            pl.BlockSpec((None, H + 2, W + 2, C), lambda b: (b, 0, 0, 0)),
            pl.BlockSpec((9, C, OFFPAD), lambda b: (0, 0, 0)),
            pl.BlockSpec((1, OFFPAD), lambda b: (0, 0)),
        ],
        out_specs=pl.BlockSpec((None, H, W, OFFPAD), lambda b: (b, 0, 0, 0)),
        compiler_params=pltpu.CompilerParams(
            dimension_semantics=("parallel",),
            vmem_limit_bytes=VMEM_LIMIT),
        cost_estimate=offset_cost,
    )(xp1, w_taps, b_pad)

    # conv_offset in the module has stride=self.stride; a strided 3x3/pad-1 conv is
    # the stride-1 conv subsampled.
    h_out = (H + 2 - 3) // stride + 1
    w_out = (W + 2 - 3) // stride + 1
    if stride != 1:
        offsets = offsets[:, ::stride, ::stride, :]
    HW = h_out * w_out

    # ---- stage 2: deform sampling + final conv
    if padding:
        x_pad = jnp.pad(x_nhwc, ((0, 0), (padding, padding), (padding, padding), (0, 0)))
    else:
        x_pad = x_nhwc
    Hp, Wp = x_pad.shape[1], x_pad.shape[2]
    P = Hp * Wp
    x_pad_flat = x_pad.reshape(B, P, C)

    # wf[n, c, o] = w_conv[o, c, n // ks, n % ks], lane-padded to OUTC_PAD
    wf = jnp.transpose(w_conv, (2, 3, 1, 0)).reshape(N, C, outc)
    wf = jnp.pad(wf, ((0, 0), (0, 0), (0, OUTC_PAD - outc))).astype(jnp.float32)

    TH = _pick_row_tile(h_out, w_out, P)
    n_t = h_out // TH

    deform_cost = pl.CostEstimate(
        flops=2 * B * HW * N * (P * C + C * OUTC_PAD),
        transcendentals=0,
        bytes_accessed=4 * (B * P * C + B * HW * OFFPAD
                            + N * C * OUTC_PAD + B * HW * OUTC_PAD))

    out = pl.pallas_call(
        functools.partial(_deform_kernel, Hp=Hp, Wp=Wp, stride=stride, ks=ks, N=N),
        out_shape=jax.ShapeDtypeStruct((B, h_out, w_out, OUTC_PAD), jnp.float32),
        grid=(B, n_t),
        in_specs=[
            pl.BlockSpec((None, TH, w_out, OFFPAD), lambda b, t: (b, t, 0, 0)),
            pl.BlockSpec((None, P, C), lambda b, t: (b, 0, 0)),
            pl.BlockSpec((N, C, OUTC_PAD), lambda b, t: (0, 0, 0)),
        ],
        out_specs=pl.BlockSpec((None, TH, w_out, OUTC_PAD), lambda b, t: (b, t, 0, 0)),
        compiler_params=pltpu.CompilerParams(
            dimension_semantics=("parallel", "parallel"),
            vmem_limit_bytes=VMEM_LIMIT),
        cost_estimate=deform_cost,
    )(offsets, x_pad_flat, wf)

    out = out[..., :outc]                                   # drop lane padding
    return jnp.transpose(out, (0, 3, 1, 2))                 # NCHW


# --------------------------------------------------------------------------- #
# Pure-JAX reference (direct transcription of the PyTorch forward)             #
# --------------------------------------------------------------------------- #
def _reference(x, w_off, b_off, w_conv, *, kernel_size, padding, stride):
    B, C, H, W = x.shape
    ks = kernel_size
    N = ks * ks
    outc = w_conv.shape[0]
    hi = lax.Precision.HIGHEST

    offset = lax.conv_general_dilated(
        x, w_off, window_strides=(stride, stride), padding=((1, 1), (1, 1)),
        dimension_numbers=("NCHW", "OIHW", "NCHW"), precision=hi)
    offset = offset + b_off[None, :, None, None]
    h_out, w_out = offset.shape[2], offset.shape[3]

    xp = jnp.pad(x, ((0, 0), (0, 0), (padding, padding), (padding, padding))) if padding else x
    Hp, Wp = xp.shape[2], xp.shape[3]

    off = jnp.transpose(offset, (0, 2, 3, 1))                     # (B, h, w, 2N)
    rng = jnp.arange(-(ks - 1) // 2, (ks - 1) // 2 + 1, dtype=jnp.float32)
    pn_r = jnp.repeat(rng, ks)[None, None, None, :]
    pn_c = jnp.tile(rng, ks)[None, None, None, :]
    base_r = (jnp.arange(h_out, dtype=jnp.float32) * stride + 1.0)[None, :, None, None]
    base_c = (jnp.arange(w_out, dtype=jnp.float32) * stride + 1.0)[None, None, :, None]
    p_r = base_r + pn_r + off[..., :N]
    p_c = base_c + pn_c + off[..., N:]

    q_lt_r = jnp.clip(jnp.floor(p_r), 0, Hp - 1)
    q_lt_c = jnp.clip(jnp.floor(p_c), 0, Wp - 1)
    q_rb_r = jnp.clip(jnp.floor(p_r) + 1, 0, Hp - 1)
    q_rb_c = jnp.clip(jnp.floor(p_c) + 1, 0, Wp - 1)
    pr = jnp.clip(p_r, 0, Hp - 1)
    pc = jnp.clip(p_c, 0, Wp - 1)
    g_lt = (1 + (q_lt_r - pr)) * (1 + (q_lt_c - pc))
    g_rb = (1 - (q_rb_r - pr)) * (1 - (q_rb_c - pc))
    g_lb = (1 + (q_lt_r - pr)) * (1 - (q_rb_c - pc))
    g_rt = (1 - (q_rb_r - pr)) * (1 + (q_lt_c - pc))

    xp_flat = xp.reshape(B, C, Hp * Wp)

    def gather(qr, qc):
        idx = (qr * Wp + qc).astype(jnp.int32).reshape(B, -1)
        g = jax.vmap(lambda xf, ii: xf[:, ii])(xp_flat, idx)      # (B, C, h*w*N)
        return g.reshape(B, C, h_out, w_out, N)

    x_lt = gather(q_lt_r, q_lt_c)
    x_rb = gather(q_rb_r, q_rb_c)
    x_lb = gather(q_lt_r, q_rb_c)
    x_rt = gather(q_rb_r, q_lt_c)

    x_off = (g_lt[:, None] * x_lt + g_rb[:, None] * x_rb
             + g_lb[:, None] * x_lb + g_rt[:, None] * x_rt)       # (B, C, h, w, N)

    wr = w_conv.reshape(outc, C, N)
    return jnp.einsum("bchwn,ocn->bohw", x_off, wr, precision=hi)


if __name__ == "__main__":
    key = jax.random.PRNGKey(0)
    k1, k2, k3 = jax.random.split(key, 3)

    B, C, H, W = 2, 4, 16, 16
    outc, ks = 8, 3
    N = ks * ks

    x = jax.random.normal(k1, (B, C, H, W), dtype=jnp.float32)
    # The PyTorch module zero-initializes conv_offset; use small deterministic
    # weights so the deformable (bilinear-sampling) path is actually exercised.
    w_off = 0.05 * jax.random.normal(k2, (2 * N, C, 3, 3), dtype=jnp.float32)
    b_off = jnp.zeros((2 * N,), dtype=jnp.float32)
    # self.conv has bias=None (falsy) -> no bias in the final conv.
    w_conv = jax.random.normal(k3, (outc, C, ks, ks), dtype=jnp.float32) / (C * N) ** 0.5

    out = deform_conv2d(x, w_off, b_off, w_conv, kernel_size=ks, padding=1, stride=1)
    jax.block_until_ready(out)
    assert out.shape == (B, outc, H, W) and out.dtype == jnp.float32

    ref = _reference(x, w_off, b_off, w_conv, kernel_size=ks, padding=1, stride=1)
    max_err = float(jnp.max(jnp.abs(out - ref)))
    assert max_err < 2e-3, f"max abs err vs reference: {max_err}"

    print("KERNEL_OK")
</pallas_src>

<mosaic_0001>
module attributes {stable_mosaic.version = 11 : i64} {
  func.func @_offset_conv_kernel(%arg0: i32, %arg1: memref<1x18x18x4xf32, #tpu.memory_space<vmem>>, %arg2: memref<9x4x128xf32, #tpu.memory_space<vmem>>, %arg3: memref<1x128xf32, #tpu.memory_space<vmem>>, %arg4: memref<1x16x16x128xf32, #tpu.memory_space<vmem>>) attributes {dimension_semantics = [#tpu.dimension_semantics<parallel>], iteration_bounds = array<i64: 2>, scalar_prefetch = 0 : i64, scratch_operands = 0 : i64, tpu.core_type = #tpu.core_type<tc>, window_params = [{transform_indices = @transform_0, window_bounds = array<i64: 1, 18, 18, 4>}, {pipeline_mode = #tpu.pipeline_mode<synchronous>, transform_indices = @transform_1, window_bounds = array<i64: 9, 4, 128>}, {pipeline_mode = #tpu.pipeline_mode<synchronous>, transform_indices = @transform_2, window_bounds = array<i64: 1, 128>}, {transform_indices = @transform_3, window_bounds = array<i64: 1, 16, 16, 128>}]} {
    %c0 = arith.constant 0 : index
    %c0_0 = arith.constant 0 : index
    %c0_1 = arith.constant 0 : index
    %c0_2 = arith.constant 0 : index
    %0 = vector.load %arg1[%c0, %c0_0, %c0_1, %c0_2] : memref<1x18x18x4xf32, #tpu.memory_space<vmem>>, vector<1x18x18x4xf32>
    %1 = vector.shape_cast %0 : vector<1x18x18x4xf32> to vector<18x18x4xf32>
    %c0_3 = arith.constant 0 : index
    %c0_4 = arith.constant 0 : index
    %c0_5 = arith.constant 0 : index
    %2 = vector.load %arg2[%c0_3, %c0_4, %c0_5] : memref<9x4x128xf32, #tpu.memory_space<vmem>>, vector<9x4x128xf32>
    %cst = arith.constant 0.000000e+00 : f32
    %3 = vector.broadcast %cst : f32 to vector<256x128xf32>
    %4 = vector.extract_strided_slice %1 {offsets = [0, 0, 0], sizes = [16, 16, 4], strides = [1, 1, 1]} : vector<18x18x4xf32> to vector<16x16x4xf32>
    %5 = vector.shape_cast %4 : vector<16x16x4xf32> to vector<256x4xf32>
    %6 = vector.extract_strided_slice %2 {offsets = [0, 0, 0], sizes = [1, 4, 128], strides = [1, 1, 1]} : vector<9x4x128xf32> to vector<1x4x128xf32>
    %7 = vector.shape_cast %6 : vector<1x4x128xf32> to vector<4x128xf32>
    %cst_6 = arith.constant dense<0.000000e+00> : vector<256x128xf32>
    %8 = tpu.matmul %5, %7, %cst_6 {dimension_numbers = #tpu.dot_dimension_numbers<[1], [0], [0], [1], [0, 0, 1, 1], [], []>} : vector<256x4xf32>, vector<4x128xf32>, vector<256x128xf32> -> vector<256x128xf32>
    %9 = arith.addf %3, %8 : vector<256x128xf32>
    %10 = vector.extract_strided_slice %1 {offsets = [0, 1, 0], sizes = [16, 16, 4], strides = [1, 1, 1]} : vector<18x18x4xf32> to vector<16x16x4xf32>
    %11 = vector.shape_cast %10 : vector<16x16x4xf32> to vector<256x4xf32>
    %12 = vector.extract_strided_slice %2 {offsets = [1, 0, 0], sizes = [1, 4, 128], strides = [1, 1, 1]} : vector<9x4x128xf32> to vector<1x4x128xf32>
    %13 = vector.shape_cast %12 : vector<1x4x128xf32> to vector<4x128xf32>
    %cst_7 = arith.constant dense<0.000000e+00> : vector<256x128xf32>
    %14 = tpu.matmul %11, %13, %cst_7 {dimension_numbers = #tpu.dot_dimension_numbers<[1], [0], [0], [1], [0, 0, 1, 1], [], []>} : vector<256x4xf32>, vector<4x128xf32>, vector<256x128xf32> -> vector<256x128xf32>
    %15 = arith.addf %9, %14 : vector<256x128xf32>
    %16 = vector.extract_strided_slice %1 {offsets = [0, 2, 0], sizes = [16, 16, 4], strides = [1, 1, 1]} : vector<18x18x4xf32> to vector<16x16x4xf32>
    %17 = vector.shape_cast %16 : vector<16x16x4xf32> to vector<256x4xf32>
    %18 = vector.extract_strided_slice %2 {offsets = [2, 0, 0], sizes = [1, 4, 128], strides = [1, 1, 1]} : vector<9x4x128xf32> to vector<1x4x128xf32>
    %19 = vector.shape_cast %18 : vector<1x4x128xf32> to vector<4x128xf32>
    %cst_8 = arith.constant dense<0.000000e+00> : vector<256x128xf32>
    %20 = tpu.matmul %17, %19, %cst_8 {dimension_numbers = #tpu.dot_dimension_numbers<[1], [0], [0], [1], [0, 0, 1, 1], [], []>} : vector<256x4xf32>, vector<4x128xf32>, vector<256x128xf32> -> vector<256x128xf32>
    %21 = arith.addf %15, %20 : vector<256x128xf32>
    %22 = vector.extract_strided_slice %1 {offsets = [1, 0, 0], sizes = [16, 16, 4], strides = [1, 1, 1]} : vector<18x18x4xf32> to vector<16x16x4xf32>
    %23 = vector.shape_cast %22 : vector<16x16x4xf32> to vector<256x4xf32>
    %24 = vector.extract_strided_slice %2 {offsets = [3, 0, 0], sizes = [1, 4, 128], strides = [1, 1, 1]} : vector<9x4x128xf32> to vector<1x4x128xf32>
    %25 = vector.shape_cast %24 : vector<1x4x128xf32> to vector<4x128xf32>
    %cst_9 = arith.constant dense<0.000000e+00> : vector<256x128xf32>
    %26 = tpu.matmul %23, %25, %cst_9 {dimension_numbers = #tpu.dot_dimension_numbers<[1], [0], [0], [1], [0, 0, 1, 1], [], []>} : vector<256x4xf32>, vector<4x128xf32>, vector<256x128xf32> -> vector<256x128xf32>
    %27 = arith.addf %21, %26 : vector<256x128xf32>
    %28 = vector.extract_strided_slice %1 {offsets = [1, 1, 0], sizes = [16, 16, 4], strides = [1, 1, 1]} : vector<18x18x4xf32> to vector<16x16x4xf32>
    %29 = vector.shape_cast %28 : vector<16x16x4xf32> to vector<256x4xf32>
    %30 = vector.extract_strided_slice %2 {offsets = [4, 0, 0], sizes = [1, 4, 128], strides = [1, 1, 1]} : vector<9x4x128xf32> to vector<1x4x128xf32>
    %31 = vector.shape_cast %30 : vector<1x4x128xf32> to vector<4x128xf32>
    %cst_10 = arith.constant dense<0.000000e+00> : vector<256x128xf32>
    %32 = tpu.matmul %29, %31, %cst_10 {dimension_numbers = #tpu.dot_dimension_numbers<[1], [0], [0], [1], [0, 0, 1, 1], [], []>} : vector<256x4xf32>, vector<4x128xf32>, vector<256x128xf32> -> vector<256x128xf32>
    %33 = arith.addf %27, %32 : vector<256x128xf32>
    %34 = vector.extract_strided_slice %1 {offsets = [1, 2, 0], sizes = [16, 16, 4], strides = [1, 1, 1]} : vector<18x18x4xf32> to vector<16x16x4xf32>
    %35 = vector.shape_cast %34 : vector<16x16x4xf32> to vector<256x4xf32>
    %36 = vector.extract_strided_slice %2 {offsets = [5, 0, 0], sizes = [1, 4, 128], strides = [1, 1, 1]} : vector<9x4x128xf32> to vector<1x4x128xf32>
    %37 = vector.shape_cast %36 : vector<1x4x128xf32> to vector<4x128xf32>
    %cst_11 = arith.constant dense<0.000000e+00> : vector<256x128xf32>
    %38 = tpu.matmul %35, %37, %cst_11 {dimension_numbers = #tpu.dot_dimension_numbers<[1], [0], [0], [1], [0, 0, 1, 1], [], []>} : vector<256x4xf32>, vector<4x128xf32>, vector<256x128xf32> -> vector<256x128xf32>
    %39 = arith.addf %33, %38 : vector<256x128xf32>
    %40 = vector.extract_strided_slice %1 {offsets = [2, 0, 0], sizes = [16, 16, 4], strides = [1, 1, 1]} : vector<18x18x4xf32> to vector<16x16x4xf32>
    %41 = vector.shape_cast %40 : vector<16x16x4xf32> to vector<256x4xf32>
    %42 = vector.extract_strided_slice %2 {offsets = [6, 0, 0], sizes = [1, 4, 128], strides = [1, 1, 1]} : vector<9x4x128xf32> to vector<1x4x128xf32>
    %43 = vector.shape_cast %42 : vector<1x4x128xf32> to vector<4x128xf32>
    %cst_12 = arith.constant dense<0.000000e+00> : vector<256x128xf32>
    %44 = tpu.matmul %41, %43, %cst_12 {dimension_numbers = #tpu.dot_dimension_numbers<[1], [0], [0], [1], [0, 0, 1, 1], [], []>} : vector<256x4xf32>, vector<4x128xf32>, vector<256x128xf32> -> vector<256x128xf32>
    %45 = arith.addf %39, %44 : vector<256x128xf32>
    %46 = vector.extract_strided_slice %1 {offsets = [2, 1, 0], sizes = [16, 16, 4], strides = [1, 1, 1]} : vector<18x18x4xf32> to vector<16x16x4xf32>
    %47 = vector.shape_cast %46 : vector<16x16x4xf32> to vector<256x4xf32>
    %48 = vector.extract_strided_slice %2 {offsets = [7, 0, 0], sizes = [1, 4, 128], strides = [1, 1, 1]} : vector<9x4x128xf32> to vector<1x4x128xf32>
    %49 = vector.shape_cast %48 : vector<1x4x128xf32> to vector<4x128xf32>
    %cst_13 = arith.constant dense<0.000000e+00> : vector<256x128xf32>
    %50 = tpu.matmul %47, %49, %cst_13 {dimension_numbers = #tpu.dot_dimension_numbers<[1], [0], [0], [1], [0, 0, 1, 1], [], []>} : vector<256x4xf32>, vector<4x128xf32>, vector<256x128xf32> -> vector<256x128xf32>
    %51 = arith.addf %45, %50 : vector<256x128xf32>
    %52 = vector.extract_strided_slice %1 {offsets = [2, 2, 0], sizes = [16, 16, 4], strides = [1, 1, 1]} : vector<18x18x4xf32> to vector<16x16x4xf32>
    %53 = vector.shape_cast %52 : vector<16x16x4xf32> to vector<256x4xf32>
    %54 = vector.extract_strided_slice %2 {offsets = [8, 0, 0], sizes = [1, 4, 128], strides = [1, 1, 1]} : vector<9x4x128xf32> to vector<1x4x128xf32>
    %55 = vector.shape_cast %54 : vector<1x4x128xf32> to vector<4x128xf32>
    %cst_14 = arith.constant dense<0.000000e+00> : vector<256x128xf32>
    %56 = tpu.matmul %53, %55, %cst_14 {dimension_numbers = #tpu.dot_dimension_numbers<[1], [0], [0], [1], [0, 0, 1, 1], [], []>} : vector<256x4xf32>, vector<4x128xf32>, vector<256x128xf32> -> vector<256x128xf32>
    %57 = arith.addf %51, %56 : vector<256x128xf32>
    %c0_15 = arith.constant 0 : index
    %c0_16 = arith.constant 0 : index
    %58 = vector.load %arg3[%c0_15, %c0_16] : memref<1x128xf32, #tpu.memory_space<vmem>>, vector<1x128xf32>
    %59 = vector.broadcast %58 : vector<1x128xf32> to vector<256x128xf32>
    %60 = arith.addf %57, %59 : vector<256x128xf32>
    %61 = vector.shape_cast %60 : vector<256x128xf32> to vector<16x16x128xf32>
    %c0_17 = arith.constant 0 : index
    %c0_18 = arith.constant 0 : index
    %c0_19 = arith.constant 0 : index
    %c0_20 = arith.constant 0 : index
    %62 = vector.load %arg4[%c0_17, %c0_18, %c0_19, %c0_20] : memref<1x16x16x128xf32, #tpu.memory_space<vmem>>, vector<1x16x16x128xf32>
    %63 = vector.shape_cast %62 : vector<1x16x16x128xf32> to vector<16x16x128xf32>
    %64 = vector.shape_cast %61 : vector<16x16x128xf32> to vector<1x16x16x128xf32>
    tpu.vector_store %arg4[%c0_17, %c0_18, %c0_19, %c0_20], %64 {strides = array<i32>} : memref<1x16x16x128xf32, #tpu.memory_space<vmem>>, vector<1x16x16x128xf32>,
    return
  }
  func.func @transform_0(%arg0: i32) -> (i32, i32, i32, i32) {
    %c0_i32 = arith.constant 0 : i32
    %c0_i32_0 = arith.constant 0 : i32
    %c0_i32_1 = arith.constant 0 : i32
    %c0_i32_2 = arith.constant 0 : i32
    return %arg0, %c0_i32, %c0_i32_0, %c0_i32_1 : i32, i32, i32, i32
  }
  func.func @transform_1(%arg0: i32) -> (i32, i32, i32) {
    %c0_i32 = arith.constant 0 : i32
    %c0_i32_0 = arith.constant 0 : i32
    %c0_i32_1 = arith.constant 0 : i32
    %c0_i32_2 = arith.constant 0 : i32
    return %c0_i32, %c0_i32_0, %c0_i32_1 : i32, i32, i32
  }
  func.func @transform_2(%arg0: i32) -> (i32, i32) {
    %c0_i32 = arith.constant 0 : i32
    %c0_i32_0 = arith.constant 0 : i32
    %c0_i32_1 = arith.constant 0 : i32
    return %c0_i32, %c0_i32_0 : i32, i32
  }
  func.func @transform_3(%arg0: i32) -> (i32, i32, i32, i32) {
    %c0_i32 = arith.constant 0 : i32
    %c0_i32_0 = arith.constant 0 : i32
    %c0_i32_1 = arith.constant 0 : i32
    %c0_i32_2 = arith.constant 0 : i32
    return %arg0, %c0_i32, %c0_i32_0, %c0_i32_1 : i32, i32, i32, i32
  }
}

</mosaic_0001>

<bundles_post_ra>
// kernel: tpu_custom_call.1
= control target key start
LH: loop header
LB: loop body
LE: loop exit
PB: predicated region body
PF: predicated region fallthrough
CT: control target
= control target key end

     0   :  { %8 = vsyncpa [#allocation3], 0  ;;  %s5840_s0 = inlined_call_operand.vmem [shape: f32[2,18,18,4], index: 0, kind: input, shape index: {}]   ;;  %s5841_s1 = inlined_call_operand.vmem [shape: f32[9,4,128], index: 1, kind: input, shape index: {}]   ;;  %s5842_s2 = inlined_call_operand.vmem [shape: f32[1,128], index: 2, kind: input, shape index: {}]   ;;  %s5843_s3 = inlined_call_operand.hbm [shape: f32[2,16,16,128], index: 3, kind: output, shape index: {}]  }
   0x1   :  { %10 = vsyncpa [#allocation3 + $0x1], 0  ;;  %s4553_s12 = smov 0   ;;  %s4555_s13 = smov 0  }
   0x2   :  { %s4557_s14 = smov 0   ;;  %s4559_s15 = smov 0  }
   0x3 LB: > { %s4574_s16 = sadd.s32 4294967295, %s4528_s15   ;;  %s3109_s17 = sadd.s32 4294967294, %s4528_s15   ;;  %s4528_s15 = sphi %s4559_s15, %s6023_s15   ;;  %s4524_s14 = sphi %s4557_s14, %s6022_s14   ;;  %s4520_s13 = sphi %s4555_s13, %s6021_s13   ;;  %s4516_s12 = sphi %s4553_s12, %s6020_s12  }
   0x4   : > { %s4578_s18 = sadd.s32 1, %s4528_s15   ;;  %s91_s19 = sadd.s32 1, %s4524_s14 }
   0x5   : > { %s88_s20 = ssub.s32 %s4528_s15, %s4578_s18  ;;  %p101_p0 = scmp.ne.s32.totalorder %s4524_s14, %s4520_s13 }
   0x6   : > { %p89_p1 = scmp.eq.s32.totalorder %s88_s20, 0  ;;  %p102_p2 = scmp.eq.s32.totalorder %s4574_s16, 1 }
   0x7   : > { %p107_p3 = scmp.ne.s32.totalorder %s4520_s13, %s4516_s12  ;;  %p108_p4 = scmp.eq.s32.totalorder %s3109_s17, 1 }
   0x8   : > { %s4589_s21 = scalar_select %p89_p1, %s4524_s14, %s91_s19  }
   0x9   : > { %p4591_p5 = por %p102_p2, %p101_p0  ;;  %p4595_p6 = por %p108_p4, %p107_p3 }
   0xa   : > { %p3112_p7 = scmp.ge.s32.totalorder %s4528_s15, 1  ;;  %p140_p8 = scmp.lt.s32.totalorder %s4528_s15, 3 }
   0xc   : > { %p141_p9 = pnand %p3112_p7, %p140_p8 }
   0xe   : > { %144 = sbr.rel (%p141_p9) target bundleno = 550 (0x226), region = 32 }
  0x15   : > { %v224_v0 = vld [vmem:[%s5841_s1 + $0x4] sm:$0xf]  ;;  %vm426_vm0 = vcmask 1043456   ;;  %v4607_v1 = vld [vmem:[%s5841_s1 + $0x10] sm:$0xf]  ;;  %p164_p10 = scmp.lt.s32.totalorder %s4574_s16, 1 }
  0x16   : > { %3716 = vmatprep.subr.msk.mxu1 %vm426_vm0, %v224_v0  ;;  %3916 = vmatprep.subr.msk.mxu0 %vm426_vm0, %v4607_v1  ;;  %v223_v2 = vld [vmem:[%s5841_s1] sm:$0xf]  ;;  %v228_v3 = vld [vmem:[%s5841_s1 + $0x14] sm:$0xf]  ;;  %vm280_vm1 = vcmask 1046528   ;;  %vm361_vm2 = vcmask 31744  }
  0x17   : > { %3717 = vmatpush3.msk.msra.mxu1 %vm426_vm0, %v224_v0  ;;  %3917 = vmatpush3.msk.msra.mxu0 %vm426_vm0, %v4607_v1  ;;  %s165_s5 = scalar_select %p164_p10, %s4574_s16, 1  ;;  %v4693_v33 = vld [vmem:[%s5841_s1 + $0x18] sm:$0xf]  ;;  %v4703_v35 = vld [vmem:[%s5841_s1 + $0x8] sm:$0xf]  ;;  %vm947_vm3 = vcmask 1045504  }
  0x18   : > { %3766 = vmatprep.subr.msk.mxu1 %vm426_vm0, %v223_v2  ;;  %3966 = vmatprep.subr.msk.mxu0 %vm426_vm0, %v228_v3  ;;  %s161_s29 = sand.u32 1, %s4520_s13   ;;  %s3418_s7 = sshll.u32 %s4574_s16, 12 }
  0x19   : > { %s4424_s6 = smul.u32 432, %s165_s5  ;;  %s3113_s30 = sshll.u32 %s161_s29, 8 }
  0x1a   : > { %s5790_s11 = scalar_lea.hbm %s5843_s3, %s3418_s7  ;;  %s5799_s16 = scalar_lea.sflag [#allocation3], %s161_s29 }
  0x1b   : > { %s4628_s9 = scalar_lea.vmem %s5840_s0, %s4424_s6  ;;  %s5723_s6 = scalar_lea.vmem [#allocation2], %s3113_s30 }
  0x1c   : > { %v4631_v4 = vld [vmem:[%s4628_s9] sm:$0xff]  ;;  %v4634_v5 = vld [vmem:[%s4628_s9 + $0x8] sm:$0xff]  ;;  %v4637_v6 = vld [vmem:[%s4628_s9 + $0x18] sm:$0xff]  ;;  %s3047_s8 = sshll.u32 %s5723_s6, 4  ;;  %s4530_s19 = smov [#allocation2]   ;;  %s5792_s8 = int_to_ptr.vmem [resolvable:$true] %s3047_s8 }
  0x1d   : > { %5919 = vst [vmem:[#allocation5_spill] sm:$0xff] %v4637_v6  ;;  %v281_v7 = vrot.slane %v4631_v4, 1  ;;  %v282_v8 = vrot.slane %v4634_v5, 1  ;;  %v4642_v9 = vld [vmem:[%s4628_s9 + $0x20] sm:$0xff]  ;;  %v286_v10 = vrot.slane %v4637_v6, 1  ;;  %v4654_v15 = vld [vmem:[%s4628_s9 + $0x30] sm:$0xff] }
  0x1e   : > { %5920 = vst [vmem:[#allocation6_spill] sm:$0xff] %v4642_v9  ;;  %v4646_v11 = vld [vmem:[%s4628_s9 + $0x10] sm:$0x3]  ;;  %v287_v12 = vrot.slane %v4642_v9, 1  ;;  %v4651_v14 = vld [vmem:[%s4628_s9 + $0x28] sm:$0x3] }
  0x1f   : > { %v284_v13 = vrot.slane %v4646_v11, 1  ;;  %v283_v16 = vsel %vm280_vm1, %v281_v7, %v282_v8  ;;  %v289_v17 = vrot.slane %v4651_v14, 1  ;;  %v4659_v18 = vld [vmem:[%s4628_s9 + $0x38] sm:$0xff]  ;;  %v291_v19 = vrot.slane %v4654_v15, 1  ;;  %v4663_v20 = vld [vmem:[%s4628_s9 + $0x40] sm:$0x3] }
  0x20   : > { %3718 = vmatprep.mubr.msk.f32.mxu1 %vm361_vm2, %v283_v16  ;;  %v288_v21 = vsel %vm280_vm1, %v286_v10, %v287_v12  ;;  %v292_v23 = vrot.slane %v4659_v18, 1  ;;  %v294_v24 = vrot.slane %v4663_v20, 1  ;;  %v4671_v25 = vld [vmem:[%s4628_s9 + $0x48] sm:$0xff]  ;;  %v4674_v26 = vld [vmem:[%s4628_s9 + $0x50] sm:$0xff]  ;;  %v4677_v27 = vld [vmem:[%s4628_s9 + $0x58] sm:$0x3] }
  0x21   : > { %v285_v22 = vsel %vm280_vm1, %v282_v8, %v284_v13  ;;  %3918 = vmatprep.mubr.msk.f32.mxu0 %vm361_vm2, %v288_v21  ;;  %v290_v28 = vsel %vm280_vm1, %v287_v12, %v289_v17  ;;  %v296_v29 = vrot.slane %v4671_v25, 1  ;;  %v297_v30 = vrot.slane %v4674_v26, 1  ;;  %v4685_v31 = vld [vmem:[%s4628_s9 + $0x60] sm:$0xff]  ;;  %v4688_v32 = vld [vmem:[%s4628_s9 + $0x68] sm:$0xff]  ;;  %v4719_v41 = vld [vmem:[%s4628_s9 + $0x70] sm:$0x3] }
  0x22   : > { %3719 = vmatmul.mubr.msk.f32.vlgmr.msra.gmra.mrb[0].mxu1 %vm361_vm2, %v285_v22  ;;  %3919 = vmatmul.mubr.msk.f32.vlgmr.msra.gmra.mrb[0].mxu0 %vm361_vm2, %v290_v28  ;;  %v4698_v34 = vsel %vm280_vm1, %v291_v19, %v292_v23  ;;  %v4708_v36 = vsel %vm280_vm1, %v292_v23, %v294_v24  ;;  %v299_v37 = vrot.slane %v4677_v27, 1  ;;  %v301_v39 = vrot.slane %v4685_v31, 1  ;;  %v4725_v42 = vld [vmem:[%s4628_s9 + $0x78] sm:$0xff]  ;;  %v4728_v43 = vld [vmem:[%s4628_s9 + $0x80] sm:$0xff]  ;;  %v4748_v49 = vld [vmem:[%s4628_s9 + $0x88] sm:$0x3] }
  0x23   : > { %3767 = vmatpush3.msk.msra.mxu1 %vm426_vm0, %v223_v2  ;;  %5921 = vst [vmem:[#allocation7_spill] sm:$0xff] %v4698_v34  ;;  %3967 = vmatpush3.msk.msra.mxu0 %vm426_vm0, %v228_v3  ;;  %5922 = vst [vmem:[#allocation8_spill] sm:$0xff] %v4708_v36  ;;  %v4714_v38 = vsel %vm280_vm1, %v296_v29, %v297_v30  ;;  %v302_v40 = vrot.slane %v4688_v32, 1  ;;  %v304_v45 = vrot.slane %v4719_v41, 1  ;;  %v306_v47 = vrot.slane %v4725_v42, 1  ;;  %v4753_v50 = vld [vmem:[%s4628_s9 + $0x90] sm:$0xff] }
  0x24   : > { %3721 = vmatprep.mubr.msk.f32.mxu1 %vm361_vm2, %v288_v21  ;;  %3921 = vmatprep.mubr.msk.f32.mxu0 %vm361_vm2, %v4698_v34  ;;  %5923 = vst [vmem:[#allocation9_spill] sm:$0xff] %v4714_v38  ;;  %v4739_v44 = vsel %vm280_vm1, %v297_v30, %v299_v37  ;;  %v307_v48 = vrot.slane %v4728_v43, 1  ;;  %v4756_v51 = vld [vmem:[%s4628_s9 + $0x98] sm:$0xff]  ;;  %v309_v53 = vrot.slane %v4748_v49, 1  ;;  %v311_v55 = vrot.slane %v4753_v50, 1  ;;  %v4779_v58 = vld [vmem:[%s4628_s9 + $0xa8] sm:$0xff] }
  0x25   : > { %4016 = vmatprep.subr.msk.mxu0 %vm426_vm0, %v4693_v33  ;;  %3816 = vmatprep.subr.msk.mxu1 %vm426_vm0, %v4703_v35  ;;  %5924 = vst [vmem:[#allocation10_spill] sm:$0xff] %v4739_v44  ;;  %v4743_v46 = vsel %vm280_vm1, %v301_v39, %v302_v40  ;;  %v4765_v52 = vsel %vm280_vm1, %v302_v40, %v304_v45  ;;  %v312_v56 = vrot.slane %v4756_v51, 1  ;;  %v4774_v57 = vld [vmem:[%s4628_s9 + $0xa0] sm:$0x3]  ;;  %v4782_v59 = vld [vmem:[%s4628_s9 + $0xb0] sm:$0xff]  ;;  %v316_v63 = vrot.slane %v4779_v58, 1 }
  0x26   : > { %3722 = vmatmul.mubr.msk.f32.gmra.mrb[2].mxu1 %vm361_vm2, %v290_v28  ;;  %3922 = vmatmul.mubr.msk.f32.gmra.mrb[2].mxu0 %vm361_vm2, %v4708_v36  ;;  %5925 = vst [vmem:[#allocation11_spill] sm:$0xff] %v4743_v46  ;;  %5926 = vst [vmem:[#allocation12_spill] sm:$0xff] %v4765_v52  ;;  %v4769_v54 = vsel %vm280_vm1, %v306_v47, %v307_v48  ;;  %v4791_v60 = vsel %vm280_vm1, %v307_v48, %v309_v53  ;;  %v314_v61 = vrot.slane %v4774_v57, 1  ;;  %v4800_v2 = vld [vmem:[%s4628_s9 + $0xb8] sm:$0x3]  ;;  %v4805_v3 = vld [vmem:[%s4628_s9 + $0xc0] sm:$0xff] }
  0x27   : > { %3724 = vmatprep.mubr.msk.f32.mxu1 %vm361_vm2, %v4698_v34  ;;  %3924 = vmatprep.mubr.msk.f32.mxu0 %vm361_vm2, %v4714_v38  ;;  %5927 = vst [vmem:[#allocation13_spill] sm:$0xff] %v4769_v54  ;;  %5928 = vst [vmem:[#allocation14_spill] sm:$0xff] %v4791_v60  ;;  %v4795_v62 = vsel %vm280_vm1, %v311_v55, %v312_v56  ;;  %v317_v0 = vrot.slane %v4782_v59, 1  ;;  %v4808_v7 = vld [vmem:[%s4628_s9 + $0xc8] sm:$0xff]  ;;  %v319_v10 = vrot.slane %v4800_v2, 1  ;;  %v321_v13 = vrot.slane %v4805_v3, 1 }
  0x28   : > { %5929 = vst [vmem:[#allocation15_spill] sm:$0xff] %v4795_v62  ;;  %v4817_v8 = vsel %vm280_vm1, %v312_v56, %v314_v61  ;;  %v322_v16 = vrot.slane %v4808_v7, 1  ;;  %v4826_v17 = vld [vmem:[%s4628_s9 + $0xd0] sm:$0x3]  ;;  %v953_v23 = vrot.slane %v4637_v6, 2  ;;  %v954_v24 = vrot.slane %v4642_v9, 2 }
  0x29   : > { %5930 = vst [vmem:[#allocation16_spill] sm:$0xff] %v4817_v8  ;;  %v4821_v12 = vsel %vm280_vm1, %v316_v63, %v317_v0  ;;  %v4837_v19 = vsel %vm280_vm1, %v317_v0, %v319_v10  ;;  %v324_v21 = vrot.slane %v4826_v17, 1  ;;  %v4846_v28 = vld [vmem:[%s4628_s9 + $0xd8] sm:$0xff]  ;;  %v4849_v29 = vld [vmem:[%s4628_s9 + $0xe0] sm:$0xff]  ;;  %v956_v30 = vrot.slane %v4651_v14, 2  ;;  %v4874_v53 = vld [vmem:[%s4628_s9 + $0xf0] sm:$0xff] }
  0x2a   : > { %3725 = vmatmul.mubr.msk.f32.gmra.mrb[4].mxu1 %vm361_vm2, %v4708_v36  ;;  %3925 = vmatmul.mubr.msk.f32.gmra.mrb[4].mxu0 %vm361_vm2, %v4739_v44  ;;  %5931 = vst [vmem:[#allocation17_spill] sm:$0xff] %v4821_v12  ;;  %5932 = vst [vmem:[#allocation18_spill] sm:$0xff] %v4837_v19  ;;  %v4841_v22 = vsel %vm280_vm1, %v321_v13, %v322_v16  ;;  %v326_v39 = vrot.slane %v4846_v28, 1  ;;  %v327_v40 = vrot.slane %v4849_v29, 1  ;;  %v4866_v45 = vld [vmem:[%s4628_s9 + $0xe8] sm:$0x3] }
  0x2b   : > { %3727 = vmatprep.mubr.msk.f32.mxu1 %vm361_vm2, %v4714_v38  ;;  %3927 = vmatprep.mubr.msk.f32.mxu0 %vm361_vm2, %v4743_v46  ;;  %5933 = vst [vmem:[#allocation19_spill] sm:$0xff] %v4841_v22  ;;  %v4861_v37 = vsel %vm280_vm1, %v322_v16, %v324_v21  ;;  %v4869_v47 = vsel %vm947_vm3, %v953_v23, %v954_v24  ;;  %v958_v48 = vrot.slane %v4654_v15, 2  ;;  %v959_v14 = vrot.slane %v4659_v18, 2  ;;  %v4877_v55 = vld [vmem:[%s4628_s9 + $0xf8] sm:$0xff]  ;;  %v4898_v16 = vld [vmem:[%s4628_s9 + $0x100] sm:$0x3] }
  0x2c   : > { %5934 = vst [vmem:[#allocation20_spill] sm:$0xff] %v4861_v37  ;;  %v329_v56 = vrot.slane %v4866_v45, 1  ;;  %v961_v61 = vrot.slane %v4663_v20, 2  ;;  %v4890_v63 = vsel %vm947_vm3, %v954_v24, %v956_v30  ;;  %v4893_v0 = vsel %vm280_vm1, %v326_v39, %v327_v40  ;;  %v4909_v24 = vld [vmem:[%s4628_s9 + $0x110] sm:$0xff]  ;;  %v4916_v30 = vld [vmem:[%s5841_s1 + $0x1c] sm:$0xf] }
  0x2d   : > { %5935 = vst [vmem:[#allocation21_spill] sm:$0xff] %v4893_v0  ;;  %v331_v10 = vrot.slane %v4874_v53, 1  ;;  %v332_v13 = vrot.slane %v4877_v55, 1  ;;  %v4901_v21 = vsel %vm947_vm3, %v958_v48, %v959_v14  ;;  %v963_v20 = vrot.slane %v4671_v25, 2  ;;  %v5012_v36 = vld [vmem:[%s4628_s9 + $0x148] sm:$0x3] }
  0x2e   : > { %3728 = vmatmul.mubr.msk.f32.gmra.mrb[6].mxu1 %vm361_vm2, %v4739_v44  ;;  %3928 = vmatmul.mubr.msk.f32.gmra.mrb[6].mxu0 %vm361_vm2, %v4765_v52  ;;  %v964_v23 = vrot.slane %v4674_v26, 2  ;;  %v4923_v39 = vsel %vm280_vm1, %v327_v40, %v329_v56  ;;  %v4926_v48 = vsel %vm947_vm3, %v959_v14, %v961_v61  ;;  %v337_v40 = vrot.slane %v4909_v24, 1  ;;  %v4940_v56 = vld [vmem:[%s4628_s9 + $0x118] sm:$0x3]  ;;  %s4466_s17 = scalar_lea.vmem %s5792_s8, 4096  ;;  %s4470_s20 = sshll.u32 %s4530_s19, 4  ;;  %s4471_s20 = int_to_ptr.vmem [resolvable:$false] %s4470_s20 }
  0x2f   : > { %3730 = vmatprep.mubr.msk.f32.mxu1 %vm361_vm2, %v4743_v46  ;;  %3930 = vmatprep.mubr.msk.f32.mxu0 %vm361_vm2, %v4769_v54  ;;  %5936 = vst [vmem:[#allocation22_spill] sm:$0xff] %v4923_v39  ;;  %5937 = vst [vmem:[#allocation23_spill] sm:$0xff] %v4926_v48  ;;  %v968_v61 = vrot.slane %v4685_v31, 2  ;;  %v4985_v46 = vld [vmem:[%s4628_s9 + $0x138] sm:$0xff]  ;;  %v976_v44 = vrot.slane %v4748_v49, 2  ;;  %v981_v34 = vrot.slane %v4774_v57, 2  ;;  %p4467_p11 = scmp.ne.s32.totalorder %s5792_s8, %s4466_s17  ;;  %p4473_p0 = scmp.lt.s32.totalorder %s5792_s8, %s4471_s20 }
  0x30   : > { %v4943_v14 = vsel %vm947_vm3, %v963_v20, %v964_v23  ;;  %v339_v20 = vrot.slane %v4940_v56, 1  ;;  %v346_v38 = vrot.slane %v4985_v46, 1  ;;  %v983_v57 = vrot.slane %v4779_v58, 2  ;;  %s4472_s24 = scalar_lea.vmem %s4471_s20, 8192 }
  0x31   : > { %5939 = vst [vmem:[#allocation25_spill] sm:$0xff] %v4943_v14  ;;  %p4468_p12 = pnand %p4467_p11, %p4591_p5  ;;  %p4474_p1 = scmp.lt.s32.totalorder %s4472_s24, %s4466_s17 }
  0x32   : > { %3731 = vmatmul.mubr.msk.f32.gmra.mrb[8].mxu1 %vm361_vm2, %v4765_v52  ;;  %3931 = vmatmul.mubr.msk.f32.gmra.mrb[8].mxu0 %vm361_vm2, %v4791_v60  ;;  %v4977_v52 = vld [vmem:[%s4628_s9 + $0x130] sm:$0x3] }
  0x33   : > { %3733 = vmatprep.mubr.msk.f32.mxu1 %vm361_vm2, %v4769_v54  ;;  %3933 = vmatprep.mubr.msk.f32.mxu0 %vm361_vm2, %v4795_v62  ;;  %p4469_p13 = pneg %p4468_p12  ;;  %p4475_p2 = por %p4474_p1, %p4473_p0 }
  0x35   : > { %p4476_p3 = pnand %p4475_p2, %p4469_p13 }
  0x36   : > { %3734 = vmatmul.mubr.msk.f32.gmra.mrb[10].mxu1 %vm361_vm2, %v4791_v60  ;;  %3934 = vmatmul.mubr.msk.f32.gmra.mrb[10].mxu0 %vm361_vm2, %v4817_v8 }
  0x37   : > { %3736 = vmatprep.mubr.msk.f32.mxu1 %vm361_vm2, %v4795_v62  ;;  %3936 = vmatprep.mubr.msk.f32.mxu0 %vm361_vm2, %v4821_v12  ;;  %v971_v62 = vrot.slane %v4719_v41, 2  ;;  %v973_v41 = vrot.slane %v4725_v42, 2 }
  0x3a   : > { %3737 = vmatmul.mubr.msk.f32.gmra.mrb[12].mxu1 %vm361_vm2, %v4817_v8  ;;  %3937 = vmatmul.mubr.msk.f32.gmra.mrb[12].mxu0 %vm361_vm2, %v4837_v19  ;;  %v4948_v8 = vld [vmem:[%s4628_s9 + $0x120] sm:$0xff] }
  0x3b   : > { %3739 = vmatprep.mubr.msk.f32.mxu1 %vm361_vm2, %v4821_v12  ;;  %3939 = vmatprep.mubr.msk.f32.mxu0 %vm361_vm2, %v4841_v22  ;;  %v966_v12 = vrot.slane %v4677_v27, 2  ;;  %v341_v54 = vrot.slane %v4948_v8, 1 }
  0x3d   : > { %v4969_v60 = vsel %vm947_vm3, %v964_v23, %v966_v12  ;;  %v4988_v12 = vld [vmem:[%s4628_s9 + $0x140] sm:$0xff] }
  0x3e   : > { %3740 = vmatmul.mubr.msk.f32.gmra.mrb[14].mxu1 %vm361_vm2, %v4837_v19  ;;  %3940 = vmatmul.mubr.msk.f32.gmra.mrb[14].mxu0 %vm361_vm2, %v4861_v37  ;;  %v4934_v19 = vsel %vm280_vm1, %v331_v10, %v332_v13  ;;  %v4951_v10 = vld [vmem:[%s4628_s9 + $0x128] sm:$0xff]  ;;  %5941 = vst [vmem:[#allocation27_spill] sm:$0xff] %v4969_v60 }
  0x3f   : > { %3742 = vmatprep.mubr.msk.f32.mxu1 %vm361_vm2, %v4841_v22  ;;  %3968 = vmatprep.mubr.msk.f32.mxu0 %vm361_vm2, %v4869_v47  ;;  %v4906_v22 = vld [vmem:[%s4628_s9 + $0x108] sm:$0xff]  ;;  %5938 = vst [vmem:[#allocation24_spill] sm:$0xff] %v4934_v19 }
  0x42   : > { %3743 = vmatmul.mubr.msk.f32.gmra.mrb[16].mxu1 %vm361_vm2, %v4861_v37  ;;  %3969 = vmatmul.mubr.msk.f32.vlgmr.msra.gmra.mrb[0].mxu0 %vm361_vm2, %v4890_v63  ;;  %v334_v37 = vrot.slane %v4898_v16, 1 }
  0x43   : > { %3745 = vmatprep.mubr.msk.f32.mxu1 %vm361_vm2, %v4893_v0  ;;  %4017 = vmatpush3.msk.msra.mxu0 %vm426_vm0, %v4693_v33  ;;  %v336_v0 = vrot.slane %v4906_v22, 1  ;;  %v969_v33 = vrot.slane %v4688_v32, 2 }
  0x44   : > { %3971 = vmatprep.mubr.msk.f32.mxu0 %vm361_vm2, %v4901_v21  ;;  %4066 = vmatprep.subr.msk.mxu0 %vm426_vm0, %v4916_v30  ;;  %v4962_v27 = vsel %vm280_vm1, %v332_v13, %v334_v37  ;;  %v974_v13 = vrot.slane %v4728_v43, 2 }
  0x45   : > { %5940 = vst [vmem:[#allocation26_spill] sm:$0xff] %v4962_v27  ;;  %v4980_v37 = vsel %vm947_vm3, %v968_v61, %v969_v33  ;;  %v5000_v23 = vsel %vm947_vm3, %v969_v33, %v971_v62  ;;  %v344_v61 = vrot.slane %v4977_v52, 1  ;;  %v978_v62 = vrot.slane %v4753_v50, 2 }
  0x46   : > { %3746 = vmatmul.mubr.msk.f32.gmra.mrb[18].mxu1 %vm361_vm2, %v4923_v39  ;;  %3972 = vmatmul.mubr.msk.f32.gmra.mrb[2].mxu0 %vm361_vm2, %v4926_v48  ;;  %v4972_v39 = vsel %vm280_vm1, %v336_v0, %v337_v40  ;;  %5943 = vst [vmem:[#allocation29_spill] sm:$0xff] %v4980_v37  ;;  %v4997_v0 = vsel %vm280_vm1, %v337_v40, %v339_v20  ;;  %5945 = vst [vmem:[#allocation31_spill] sm:$0xff] %v5000_v23  ;;  %v979_v33 = vrot.slane %v4756_v51, 2  ;;  %v5020_v20 = vld [vmem:[%s4628_s9 + $0x150] sm:$0xff]  ;;  %v5082_v48 = vld [vmem:[%s4628_s9 + $0x178] sm:$0x3] }
  0x47   : > { %3748 = vmatprep.mubr.msk.f32.mxu1 %vm361_vm2, %v4934_v19  ;;  %3974 = vmatprep.mubr.msk.f32.mxu0 %vm361_vm2, %v4943_v14  ;;  %5942 = vst [vmem:[#allocation28_spill] sm:$0xff] %v4972_v39  ;;  %v342_v19 = vrot.slane %v4951_v10, 1  ;;  %5944 = vst [vmem:[#allocation30_spill] sm:$0xff] %v4997_v0  ;;  %v5015_v40 = vsel %vm947_vm3, %v973_v41, %v974_v13  ;;  %v349_v41 = vrot.slane %v5012_v36, 1 }
  0x48   : > { %5947 = vst [vmem:[#allocation33_spill] sm:$0xff] %v5015_v40 }
  0x49   : > { %v5032_v49 = vsel %vm280_vm1, %v342_v19, %v344_v61  ;;  %v984_v61 = vrot.slane %v4782_v59, 2 }
  0x4a   : > { %3749 = vmatmul.mubr.msk.f32.gmra.mrb[20].mxu1 %vm361_vm2, %v4962_v27  ;;  %3975 = vmatmul.mubr.msk.f32.gmra.mrb[4].mxu0 %vm361_vm2, %v4969_v60  ;;  %v5006_v27 = vsel %vm280_vm1, %v341_v54, %v342_v19  ;;  %v5023_v54 = vld [vmem:[%s4628_s9 + $0x158] sm:$0xff]  ;;  %5948 = vst [vmem:[#allocation34_spill] sm:$0xff] %v5032_v49  ;;  %v5047_v60 = vld [vmem:[%s4628_s9 + $0x160] sm:$0x3]  ;;  %v5050_v19 = vsel %vm947_vm3, %v978_v62, %v979_v33 }
  0x4b   : > { %3751 = vmatprep.mubr.msk.f32.mxu1 %vm361_vm2, %v4972_v39  ;;  %3977 = vmatprep.mubr.msk.f32.mxu0 %vm361_vm2, %v4980_v37  ;;  %5946 = vst [vmem:[#allocation32_spill] sm:$0xff] %v5006_v27  ;;  %v347_v39 = vrot.slane %v4988_v12, 1  ;;  %v5039_v37 = vsel %vm947_vm3, %v974_v13, %v976_v44  ;;  %v5058_v44 = vld [vmem:[%s4628_s9 + $0x170] sm:$0xff]  ;;  %v5070_v13 = vsel %vm947_vm3, %v979_v33, %v981_v34  ;;  %v354_v62 = vrot.slane %v5047_v60, 1 }
  0x4c   : > { %5949 = vst [vmem:[#allocation35_spill] sm:$0xff] %v5039_v37  ;;  %5951 = vst [vmem:[#allocation37_spill] sm:$0xff] %v5058_v44  ;;  %v988_v34 = vrot.slane %v4805_v3, 2  ;;  %v989_v33 = vrot.slane %v4808_v7, 2 }
  0x4d   : > { %5953 = vst [vmem:[#allocation39_spill] sm:$0xff] %v5070_v13 }
  0x4e   : > { %3752 = vmatmul.mubr.msk.f32.gmra.mrb[22].mxu1 %vm361_vm2, %v4997_v0  ;;  %3978 = vmatmul.mubr.msk.f32.gmra.mrb[6].mxu0 %vm361_vm2, %v5000_v23  ;;  %v5042_v0 = vsel %vm280_vm1, %v346_v38, %v347_v39  ;;  %v351_v23 = vrot.slane %v5020_v20, 1  ;;  %v5067_v38 = vsel %vm280_vm1, %v347_v39, %v349_v41  ;;  %v5085_v39 = vsel %vm947_vm3, %v983_v57, %v984_v61 }
  0x4f   : > { %3754 = vmatprep.mubr.msk.f32.mxu1 %vm361_vm2, %v5006_v27  ;;  %3980 = vmatprep.mubr.msk.f32.mxu0 %vm361_vm2, %v5015_v40  ;;  %5950 = vst [vmem:[#allocation36_spill] sm:$0xff] %v5042_v0  ;;  %v352_v27 = vrot.slane %v5023_v54, 1  ;;  %v5055_v40 = vld [vmem:[%s4628_s9 + $0x168] sm:$0xff]  ;;  %5952 = vst [vmem:[#allocation38_spill] sm:$0xff] %v5067_v38 }
  0x51   : > { %v5076_v14 = vsel %vm280_vm1, %v351_v23, %v352_v27  ;;  %v359_v23 = vrot.slane %v5082_v48, 1 }
  0x52   : > { %3755 = vmatmul.mubr.msk.f32.gmra.mrb[24].mxu1 %vm361_vm2, %v5032_v49  ;;  %3981 = vmatmul.mubr.msk.f32.gmra.mrb[8].mxu0 %vm361_vm2, %v5039_v37  ;;  %5954 = vst [vmem:[#allocation40_spill] sm:$0xff] %v5076_v14  ;;  %v986_v49 = vrot.slane %v4800_v2, 2  ;;  %v356_v37 = vrot.slane %v5055_v40, 1  ;;  %v5096_v2 = vsel %vm280_vm1, %v352_v27, %v354_v62  ;;  %v994_v27 = vrot.slane %v4849_v29, 2 }
  0x53   : > { %3757 = vmatprep.mubr.msk.f32.mxu1 %vm361_vm2, %v5042_v0  ;;  %3983 = vmatprep.mubr.msk.f32.mxu0 %vm361_vm2, %v5050_v19  ;;  %v357_v0 = vrot.slane %v5058_v44, 1  ;;  %5955 = vst [vmem:[#allocation41_spill] sm:$0xff] %v5096_v2  ;;  %v998_v62 = vrot.slane %v4874_v53, 2 }
  0x54   : > { %v5102_v41 = vsel %vm947_vm3, %v984_v61, %v986_v49  ;;  %v996_v49 = vrot.slane %v4866_v45, 2 }
  0x55   : > { %v5105_v57 = vsel %vm280_vm1, %v356_v37, %v357_v0  ;;  %v5120_v37 = vsel %vm280_vm1, %v357_v0, %v359_v23  ;;  %v5155_v23 = vld [vmem:[%s5841_s1 + $0xc] sm:$0xf] }
  0x56   : > { %3758 = vmatmul.mubr.msk.f32.gmra.mrb[26].mxu1 %vm361_vm2, %v5067_v38  ;;  %3984 = vmatmul.mubr.msk.f32.gmra.mrb[10].mxu0 %vm361_vm2, %v5070_v13  ;;  %5956 = vst [vmem:[#allocation42_spill] sm:$0xff] %v5105_v57  ;;  %v991_v38 = vrot.slane %v4826_v17, 2  ;;  %v5109_v13 = vsel %vm947_vm3, %v988_v34, %v989_v33  ;;  %5957 = vst [vmem:[#allocation43_spill] sm:$0xff] %v5120_v37  ;;  %v999_v34 = vrot.slane %v4877_v55, 2 }
  0x57   : > { %3760 = vmatprep.mubr.msk.f32.mxu1 %vm361_vm2, %v5076_v14  ;;  %3986 = vmatprep.mubr.msk.f32.mxu0 %vm361_vm2, %v5085_v39  ;;  %v993_v14 = vrot.slane %v4846_v28, 2  ;;  %v5142_v45 = vsel %vm947_vm3, %v994_v27, %v996_v49 }
  0x58   : > { %v5125_v17 = vsel %vm947_vm3, %v989_v33, %v991_v38  ;;  %v5146_v0 = vsel %vm947_vm3, %v998_v62, %v999_v34  ;;  %v1003_v38 = vrot.slane %v4906_v22, 2  ;;  %v1004_v33 = vrot.slane %v4909_v24, 2 }
  0x59   : > { %v5129_v61 = vsel %vm947_vm3, %v993_v14, %v994_v27  ;;  %v1001_v14 = vrot.slane %v4898_v16, 2  ;;  %v1006_v27 = vrot.slane %v4940_v56, 2  ;;  %v1008_v62 = vrot.slane %v4948_v8, 2 }
  0x5a   : > { %3761 = vmatmul.mubr.msk.f32.gmra.mrb[28].mxu1 %vm361_vm2, %v5096_v2  ;;  %3987 = vmatmul.mubr.msk.f32.gmra.mrb[12].mxu0 %vm361_vm2, %v5102_v41  ;;  %v5170_v49 = vsel %vm947_vm3, %v1003_v38, %v1004_v33  ;;  %v1013_v38 = vrot.slane %v4985_v46, 2  ;;  %v1024_v2 = vrot.slane %v5058_v44, 2 }
  0x5b   : > { %3763 = vmatprep.mubr.msk.f32.mxu1 %vm361_vm2, %v5105_v57  ;;  %3989 = vmatprep.mubr.msk.f32.mxu0 %vm361_vm2, %v5109_v13  ;;  %v5166_v16 = vsel %vm947_vm3, %v999_v34, %v1001_v14  ;;  %5958 = vst [vmem:[#allocation44_spill] sm:$0xff] %v5170_v49  ;;  %v5185_v56 = vsel %vm947_vm3, %v1004_v33, %v1006_v27  ;;  %v1011_v34 = vrot.slane %v4977_v52, 2  ;;  %v1016_v33 = vrot.slane %v5012_v36, 2 }
  0x5c   : > { %v1019_v57 = vrot.slane %v5023_v54, 2 }
  0x5e   : > { %3764 = vmatmul.mubr.msk.f32.gmra.mrb[30].mxu1 %vm361_vm2, %v5120_v37  ;;  %3990 = vmatmul.mubr.msk.f32.gmra.mrb[14].mxu0 %vm361_vm2, %v5125_v17  ;;  %v1014_v37 = vrot.slane %v4988_v12, 2 }
  0x5f   : > { %3768 = vmatprep.mubr.msk.f32.mxu1 %vm361_vm2, %v4631_v4  ;;  %3992 = vmatprep.mubr.msk.f32.mxu0 %vm361_vm2, %v5129_v61 }
  0x60   : > { %v5206_v27 = vsel %vm947_vm3, %v1013_v38, %v1014_v37  ;;  %v5219_v36 = vsel %vm947_vm3, %v1014_v37, %v1016_v33  ;;  %v1023_v38 = vrot.slane %v5055_v40, 2  ;;  %v1026_v37 = vrot.slane %v5082_v48, 2 }
  0x61   : > { %5960 = vst [vmem:[#allocation46_spill] sm:$0xff] %v5206_v27  ;;  %5961 = vst [vmem:[#allocation47_spill] sm:$0xff] %v5219_v36 }
  0x62   : > { %3769 = vmatmul.mubr.msk.f32.vlgmr.msra.gmra.mrb[0].mxu1 %vm361_vm2, %v4634_v5  ;;  %3993 = vmatmul.mubr.msk.f32.gmra.mrb[16].mxu0 %vm361_vm2, %v5142_v45  ;;  %v5246_v33 = vsel %vm947_vm3, %v1023_v38, %v1024_v2  ;;  %v5262_v48 = vsel %vm947_vm3, %v1024_v2, %v1026_v37  ;;  %v949_v38 = vrot.slane %v4634_v5, 2  ;;  %v951_v37 = vrot.slane %v4646_v11, 2  ;;  %v5968_v5 = vld [vmem:[#allocation23_spill] sm:$0xff]  ;;  %v5969_v11 = vld [vmem:[#allocation25_spill] sm:$0xff] }
  0x63   : > { %3817 = vmatpush3.msk.msra.mxu1 %vm426_vm0, %v4703_v35  ;;  %3771 = vmatprep.mubr.msk.f32.mxu1 %vm361_vm2, %v4637_v6  ;;  %v1009_v35 = vrot.slane %v4951_v10, 2  ;;  %v5233_v6 = vld [vmem:[%s4628_s9 + $0x188] sm:$0xff]  ;;  %5964 = vst [vmem:[#allocation50_spill] sm:$0xff] %v5246_v33  ;;  %5965 = vst [vmem:[#allocation51_spill] sm:$0xff] %v5262_v48 }
  0x64   : > { %3995 = vmatprep.mubr.msk.f32.mxu0 %vm361_vm2, %v5146_v0  ;;  %3866 = vmatprep.subr.msk.mxu1 %vm426_vm0, %v5155_v23 }
  0x65   : > { %v5189_v14 = vsel %vm947_vm3, %v1008_v62, %v1009_v35  ;;  %v5202_v52 = vsel %vm947_vm3, %v1009_v35, %v1011_v34  ;;  %v1018_v62 = vrot.slane %v5020_v20, 2  ;;  %v1021_v35 = vrot.slane %v5047_v60, 2 }
  0x66   : > { %3772 = vmatmul.mubr.msk.f32.gmra.mrb[2].mxu1 %vm361_vm2, %v4642_v9  ;;  %3996 = vmatmul.mubr.msk.f32.gmra.mrb[18].mxu0 %vm361_vm2, %v5166_v16  ;;  %5959 = vst [vmem:[#allocation45_spill] sm:$0xff] %v5202_v52  ;;  %v5230_v9 = vld [vmem:[%s4628_s9 + $0x180] sm:$0xff] }
  0x67   : > { %3774 = vmatprep.mubr.msk.f32.mxu1 %vm361_vm2, %v4654_v15  ;;  %3998 = vmatprep.mubr.msk.f32.mxu0 %vm361_vm2, %v5170_v49  ;;  %v5223_v34 = vsel %vm947_vm3, %v1018_v62, %v1019_v57  ;;  %v5242_v60 = vsel %vm947_vm3, %v1019_v57, %v1021_v35  ;;  %v1888_v62 = vrot.slane %v5230_v9, 2 }
  0x68   : > { %5962 = vst [vmem:[#allocation48_spill] sm:$0xff] %v5223_v34  ;;  %5963 = vst [vmem:[#allocation49_spill] sm:$0xff] %v5242_v60 }
  0x6a   : > { %3775 = vmatmul.mubr.msk.f32.gmra.mrb[4].mxu1 %vm361_vm2, %v4659_v18  ;;  %3999 = vmatmul.mubr.msk.f32.gmra.mrb[20].mxu0 %vm361_vm2, %v5185_v56 }
  0x6b   : > { %3777 = vmatprep.mubr.msk.f32.mxu1 %vm361_vm2, %v4671_v25  ;;  %4001 = vmatprep.mubr.msk.f32.mxu0 %vm361_vm2, %v5189_v14 }
  0x6e   : > { %3778 = vmatmul.mubr.msk.f32.gmra.mrb[6].mxu1 %vm361_vm2, %v4674_v26  ;;  %4002 = vmatmul.mubr.msk.f32.gmra.mrb[22].mxu0 %vm361_vm2, %v5202_v52  ;;  %v5251_v52 = vld [vmem:[%s4628_s9 + $0x190] sm:$0x3] }
  0x6f   : > { %3780 = vmatprep.mubr.msk.f32.mxu1 %vm361_vm2, %v4685_v31  ;;  %4004 = vmatprep.mubr.msk.f32.mxu0 %vm361_vm2, %v5206_v27  ;;  %v1889_v27 = vrot.slane %v5233_v6, 2  ;;  %v1891_v57 = vrot.slane %v5251_v52, 2 }
  0x71   : > { %v5266_v35 = vsel %vm947_vm3, %v1888_v62, %v1889_v27  ;;  %v5277_v2 = vsel %vm947_vm3, %v1889_v27, %v1891_v57  ;;  %v5292_v27 = vld [vmem:[%s5841_s1 + $0x20] sm:$0xf] }
  0x72   : > { %3781 = vmatmul.mubr.msk.f32.gmra.mrb[8].mxu1 %vm361_vm2, %v4688_v32  ;;  %4005 = vmatmul.mubr.msk.f32.gmra.mrb[24].mxu0 %vm361_vm2, %v5219_v36  ;;  %5966 = vst [vmem:[#allocation52_spill] sm:$0xff] %v5266_v35  ;;  %5967 = vst [vmem:[#allocation53_spill] sm:$0xff] %v5277_v2  ;;  %v5973_v57 = vld [vmem:[#allocation33_spill] sm:$0xff] }
  0x73   : > { %3783 = vmatprep.mubr.msk.f32.mxu1 %vm361_vm2, %v4725_v42  ;;  %4007 = vmatprep.mubr.msk.f32.mxu0 %vm361_vm2, %v5223_v34 }
  0x76   : > { %3784 = vmatmul.mubr.msk.f32.gmra.mrb[10].mxu1 %vm361_vm2, %v4728_v43  ;;  %4008 = vmatmul.mubr.msk.f32.gmra.mrb[26].mxu0 %vm361_vm2, %v5242_v60 }
  0x77   : > { %3786 = vmatprep.mubr.msk.f32.mxu1 %vm361_vm2, %v4753_v50  ;;  %4010 = vmatprep.mubr.msk.f32.mxu0 %vm361_vm2, %v5246_v33 }
  0x7a   : > { %3787 = vmatmul.mubr.msk.f32.gmra.mrb[12].mxu1 %vm361_vm2, %v4756_v51  ;;  %4011 = vmatmul.mubr.msk.f32.gmra.mrb[28].mxu0 %vm361_vm2, %v5262_v48 }
  0x7b   : > { %3789 = vmatprep.mubr.msk.f32.mxu1 %vm361_vm2, %v4779_v58  ;;  %4013 = vmatprep.mubr.msk.f32.mxu0 %vm361_vm2, %v5266_v35  ;;  %v5978_v35 = vld [vmem:[#allocation9_spill] sm:$0xff] }
  0x7e   : > { %3790 = vmatmul.mubr.msk.f32.gmra.mrb[14].mxu1 %vm361_vm2, %v4782_v59  ;;  %4014 = vmatmul.mubr.msk.f32.gmra.mrb[30].mxu0 %vm361_vm2, %v5277_v2  ;;  %v5977_v2 = vld [vmem:[#allocation8_spill] sm:$0xff] }
  0x7f   : > { %3792 = vmatprep.mubr.msk.f32.mxu1 %vm361_vm2, %v4805_v3  ;;  %4018 = vmatprep.mubr.msk.f32.mxu0 %vm361_vm2, %v4654_v15 }
  0x82   : > { %3793 = vmatmul.mubr.msk.f32.gmra.mrb[16].mxu1 %vm361_vm2, %v4808_v7  ;;  %4019 = vmatmul.mubr.msk.f32.vlgmr.msra.gmra.mrb[0].mxu0 %vm361_vm2, %v4659_v18 }
  0x83   : > { %3795 = vmatprep.mubr.msk.f32.mxu1 %vm361_vm2, %v4846_v28  ;;  %4067 = vmatpush3.msk.msra.mxu0 %vm426_vm0, %v4916_v30  ;;  %v948_v30 = vrot.slane %v4631_v4, 2  ;;  %v952_v4 = vsel %vm947_vm3, %v949_v38, %v951_v37  ;;  %v5975_v37 = vld [vmem:[#allocation39_spill] sm:$0xff] }
  0x84   : > { %4021 = vmatprep.mubr.msk.f32.mxu0 %vm361_vm2, %v4671_v25  ;;  %4116 = vmatprep.subr.msk.mxu0 %vm426_vm0, %v5292_v27 }
  0x85   : > { %v950_v62 = vsel %vm947_vm3, %v948_v30, %v949_v38  ;;  %v5974_v30 = vld [vmem:[#allocation35_spill] sm:$0xff]  ;;  %v5416_v38 = vld [vmem:[%s4628_s9 + $0x198] sm:$0xff] }
  0x86   : > { %3796 = vmatmul.mubr.msk.f32.gmra.mrb[18].mxu1 %vm361_vm2, %v4849_v29  ;;  %4022 = vmatmul.mubr.msk.f32.gmra.mrb[2].mxu0 %vm361_vm2, %v4674_v26 }
  0x87   : > { %3798 = vmatprep.mubr.msk.f32.mxu1 %vm361_vm2, %v4874_v53  ;;  %4024 = vmatprep.mubr.msk.f32.mxu0 %vm361_vm2, %v4685_v31 }
  0x8a   : > { %3799 = vmatmul.mubr.msk.f32.gmra.mrb[20].mxu1 %vm361_vm2, %v4877_v55  ;;  %4025 = vmatmul.mubr.msk.f32.gmra.mrb[4].mxu0 %vm361_vm2, %v4688_v32 }
  0x8b   : > { %3801 = vmatprep.mubr.msk.f32.mxu1 %vm361_vm2, %v4906_v22  ;;  %4027 = vmatprep.mubr.msk.f32.mxu0 %vm361_vm2, %v4725_v42 }
  0x8e   : > { %3802 = vmatmul.mubr.msk.f32.gmra.mrb[22].mxu1 %vm361_vm2, %v4909_v24  ;;  %4028 = vmatmul.mubr.msk.f32.gmra.mrb[6].mxu0 %vm361_vm2, %v4728_v43 }
  0x8f   : > { %3804 = vmatprep.mubr.msk.f32.mxu1 %vm361_vm2, %v4948_v8  ;;  %4030 = vmatprep.mubr.msk.f32.mxu0 %vm361_vm2, %v4753_v50 }
  0x92   : > { %3805 = vmatmul.mubr.msk.f32.gmra.mrb[24].mxu1 %vm361_vm2, %v4951_v10  ;;  %4031 = vmatmul.mubr.msk.f32.gmra.mrb[8].mxu0 %vm361_vm2, %v4756_v51 }
  0x93   : > { %3807 = vmatprep.mubr.msk.f32.mxu1 %vm361_vm2, %v4985_v46  ;;  %4033 = vmatprep.mubr.msk.f32.mxu0 %vm361_vm2, %v4779_v58 }
  0x96   : > { %3808 = vmatmul.mubr.msk.f32.gmra.mrb[26].mxu1 %vm361_vm2, %v4988_v12  ;;  %4034 = vmatmul.mubr.msk.f32.gmra.mrb[10].mxu0 %vm361_vm2, %v4782_v59 }
  0x97   : > { %3810 = vmatprep.mubr.msk.f32.mxu1 %vm361_vm2, %v5020_v20  ;;  %4036 = vmatprep.mubr.msk.f32.mxu0 %vm361_vm2, %v4805_v3 }
  0x9a   : > { %3811 = vmatmul.mubr.msk.f32.gmra.mrb[28].mxu1 %vm361_vm2, %v5023_v54  ;;  %4037 = vmatmul.mubr.msk.f32.gmra.mrb[12].mxu0 %vm361_vm2, %v4808_v7 }
  0x9b   : > { %3813 = vmatprep.mubr.msk.f32.mxu1 %vm361_vm2, %v5055_v40  ;;  %4039 = vmatprep.mubr.msk.f32.mxu0 %vm361_vm2, %v4846_v28 }
  0x9e   : > { %3814 = vmatmul.mubr.msk.f32.gmra.mrb[30].mxu1 %vm361_vm2, %v5058_v44  ;;  %4040 = vmatmul.mubr.msk.f32.gmra.mrb[14].mxu0 %vm361_vm2, %v4849_v29 }
  0x9f   : > { %3818 = vmatprep.mubr.msk.f32.mxu1 %vm361_vm2, %v950_v62  ;;  %4042 = vmatprep.mubr.msk.f32.mxu0 %vm361_vm2, %v4874_v53  ;;  %v5427_v62 = vld [vmem:[%s4628_s9 + $0x1a0] sm:$0xff] }
  0xa2   : > { %3819 = vmatmul.mubr.msk.f32.vlgmr.msra.gmra.mrb[0].mxu1 %vm361_vm2, %v952_v4  ;;  %4043 = vmatmul.mubr.msk.f32.gmra.mrb[16].mxu0 %vm361_vm2, %v4877_v55  ;;  %v5976_v4 = vld [vmem:[#allocation7_spill] sm:$0xff] }
  0xa3   : > { %3867 = vmatpush3.msk.msra.mxu1 %vm426_vm0, %v5155_v23  ;;  %3821 = vmatprep.mubr.msk.f32.mxu1 %vm361_vm2, %v4869_v47  ;;  %v5970_v47 = vld [vmem:[#allocation27_spill] sm:$0xff] }
  0xa4   : > { %4045 = vmatprep.mubr.msk.f32.mxu0 %vm361_vm2, %v4906_v22  ;;  %4166 = vmatprep.subr.msk.mxu1 %vm426_vm0, %v4607_v1  ;;  %v5972_v23 = vld [vmem:[#allocation31_spill] sm:$0xff] }
  0xa6   : > { %3822 = vmatmul.mubr.msk.f32.gmra.mrb[2].mxu1 %vm361_vm2, %v4890_v63  ;;  %4046 = vmatmul.mubr.msk.f32.gmra.mrb[18].mxu0 %vm361_vm2, %v4909_v24  ;;  %v5971_v63 = vld [vmem:[#allocation29_spill] sm:$0xff] }
  0xa7   : > { %3824 = vmatprep.mubr.msk.f32.mxu1 %vm361_vm2, %v4901_v21  ;;  %4048 = vmatprep.mubr.msk.f32.mxu0 %vm361_vm2, %v4948_v8 }
  0xaa   : > { %3825 = vmatmul.mubr.msk.f32.gmra.mrb[4].mxu1 %vm361_vm2, %v5968_v5  ;;  %4049 = vmatmul.mubr.msk.f32.gmra.mrb[20].mxu0 %vm361_vm2, %v4951_v10 }
  0xab   : > { %3827 = vmatprep.mubr.msk.f32.mxu1 %vm361_vm2, %v5969_v11  ;;  %4051 = vmatprep.mubr.msk.f32.mxu0 %vm361_vm2, %v4985_v46 }
  0xae   : > { %3828 = vmatmul.mubr.msk.f32.gmra.mrb[6].mxu1 %vm361_vm2, %v5970_v47  ;;  %4052 = vmatmul.mubr.msk.f32.gmra.mrb[22].mxu0 %vm361_vm2, %v4988_v12 }
  0xaf   : > { %3830 = vmatprep.mubr.msk.f32.mxu1 %vm361_vm2, %v5971_v63  ;;  %4054 = vmatprep.mubr.msk.f32.mxu0 %vm361_vm2, %v5020_v20 }
  0xb2   : > { %3831 = vmatmul.mubr.msk.f32.gmra.mrb[8].mxu1 %vm361_vm2, %v5972_v23  ;;  %4055 = vmatmul.mubr.msk.f32.gmra.mrb[24].mxu0 %vm361_vm2, %v5023_v54 }
  0xb3   : > { %3833 = vmatprep.mubr.msk.f32.mxu1 %vm361_vm2, %v5973_v57  ;;  %4057 = vmatprep.mubr.msk.f32.mxu0 %vm361_vm2, %v5055_v40 }
  0xb6   : > { %3834 = vmatmul.mubr.msk.f32.gmra.mrb[10].mxu1 %vm361_vm2, %v5974_v30  ;;  %4058 = vmatmul.mubr.msk.f32.gmra.mrb[26].mxu0 %vm361_vm2, %v5058_v44  ;;  %v5979_v44 = vld [vmem:[#allocation10_spill] sm:$0xff] }
  0xb7   : > { %3836 = vmatprep.mubr.msk.f32.mxu1 %vm361_vm2, %v5050_v19  ;;  %4060 = vmatprep.mubr.msk.f32.mxu0 %vm361_vm2, %v5230_v9 }
  0xba   : > { %3837 = vmatmul.mubr.msk.f32.gmra.mrb[12].mxu1 %vm361_vm2, %v5975_v37  ;;  %4061 = vmatmul.mubr.msk.f32.gmra.mrb[28].mxu0 %vm361_vm2, %v5233_v6 }
  0xbb   : > { %3839 = vmatprep.mubr.msk.f32.mxu1 %vm361_vm2, %v5085_v39  ;;  %4063 = vmatprep.mubr.msk.f32.mxu0 %vm361_vm2, %v5416_v38 }
  0xbe   : > { %3840 = vmatmul.mubr.msk.f32.gmra.mrb[14].mxu1 %vm361_vm2, %v5102_v41  ;;  %4064 = vmatmul.mubr.msk.f32.gmra.mrb[30].mxu0 %vm361_vm2, %v5427_v62 }
  0xbf   : > { %3842 = vmatprep.mubr.msk.f32.mxu1 %vm361_vm2, %v5109_v13  ;;  %4068 = vmatprep.mubr.msk.f32.mxu0 %vm361_vm2, %v5976_v4  ;;  %v5980_v4 = vld [vmem:[#allocation11_spill] sm:$0xff] }
  0xc2   : > { %3843 = vmatmul.mubr.msk.f32.gmra.mrb[16].mxu1 %vm361_vm2, %v5125_v17  ;;  %4069 = vmatmul.mubr.msk.f32.vlgmr.msra.gmra.mrb[0].mxu0 %vm361_vm2, %v5977_v2  ;;  %v5981_v2 = vld [vmem:[#allocation12_spill] sm:$0xff] }
  0xc3   : > { %3845 = vmatprep.mubr.msk.f32.mxu1 %vm361_vm2, %v5129_v61  ;;  %4117 = vmatpush3.msk.msra.mxu0 %vm426_vm0, %v5292_v27  ;;  %v5984_v27 = vld [vmem:[#allocation15_spill] sm:$0xff] }
  0xc4   : > { %4071 = vmatprep.mubr.msk.f32.mxu0 %vm361_vm2, %v5978_v35  ;;  %v5982_v35 = vld [vmem:[#allocation13_spill] sm:$0xff] }
  0xc6   : > { %3846 = vmatmul.mubr.msk.f32.gmra.mrb[18].mxu1 %vm361_vm2, %v5142_v45  ;;  %4072 = vmatmul.mubr.msk.f32.gmra.mrb[2].mxu0 %vm361_vm2, %v5979_v44  ;;  %v5983_v44 = vld [vmem:[#allocation14_spill] sm:$0xff] }
  0xc7   : > { %3848 = vmatprep.mubr.msk.f32.mxu1 %vm361_vm2, %v5146_v0  ;;  %4074 = vmatprep.mubr.msk.f32.mxu0 %vm361_vm2, %v5980_v4  ;;  %v5985_v4 = vld [vmem:[#allocation45_spill] sm:$0xff] }
  0xca   : > { %3849 = vmatmul.mubr.msk.f32.gmra.mrb[20].mxu1 %vm361_vm2, %v5166_v16  ;;  %4075 = vmatmul.mubr.msk.f32.gmra.mrb[4].mxu0 %vm361_vm2, %v5981_v2  ;;  %v5986_v2 = vld [vmem:[#allocation16_spill] sm:$0xff] }
  0xcb   : > { %3851 = vmatprep.mubr.msk.f32.mxu1 %vm361_vm2, %v5170_v49  ;;  %4077 = vmatprep.mubr.msk.f32.mxu0 %vm361_vm2, %v5982_v35  ;;  %v5987_v49 = vld [vmem:[#allocation46_spill] sm:$0xff]  ;;  %v5988_v35 = vld [vmem:[#allocation17_spill] sm:$0xff] }
  0xce   : > { %3852 = vmatmul.mubr.msk.f32.gmra.mrb[22].mxu1 %vm361_vm2, %v5185_v56  ;;  %4078 = vmatmul.mubr.msk.f32.gmra.mrb[6].mxu0 %vm361_vm2, %v5983_v44  ;;  %v5989_v44 = vld [vmem:[#allocation18_spill] sm:$0xff] }
  0xcf   : > { %3854 = vmatprep.mubr.msk.f32.mxu1 %vm361_vm2, %v5189_v14  ;;  %4080 = vmatprep.mubr.msk.f32.mxu0 %vm361_vm2, %v5984_v27  ;;  %v5990_v27 = vld [vmem:[#allocation19_spill] sm:$0xff] }
  0xd2   : > { %3855 = vmatmul.mubr.msk.f32.gmra.mrb[24].mxu1 %vm361_vm2, %v5985_v4  ;;  %4081 = vmatmul.mubr.msk.f32.gmra.mrb[8].mxu0 %vm361_vm2, %v5986_v2  ;;  %v5991_v2 = vld [vmem:[#allocation20_spill] sm:$0xff] }
  0xd3   : > { %3857 = vmatprep.mubr.msk.f32.mxu1 %vm361_vm2, %v5987_v49  ;;  %4083 = vmatprep.mubr.msk.f32.mxu0 %vm361_vm2, %v5988_v35  ;;  %v5992_v35 = vld [vmem:[#allocation21_spill] sm:$0xff] }
  0xd6   : > { %3858 = vmatmul.mubr.msk.f32.gmra.mrb[26].mxu1 %vm361_vm2, %v5219_v36  ;;  %4084 = vmatmul.mubr.msk.f32.gmra.mrb[10].mxu0 %vm361_vm2, %v5989_v44  ;;  %v5993_v44 = vld [vmem:[#allocation22_spill] sm:$0xff] }
  0xd7   : > { %3860 = vmatprep.mubr.msk.f32.mxu1 %vm361_vm2, %v5223_v34  ;;  %4086 = vmatprep.mubr.msk.f32.mxu0 %vm361_vm2, %v5990_v27  ;;  %v5994_v34 = vld [vmem:[#allocation5_spill] sm:$0xff]  ;;  %v5995_v27 = vld [vmem:[#allocation24_spill] sm:$0xff]  ;;  %v5554_v36 = vld [vmem:[%s4628_s9 + $0x1a8] sm:$0x3] }
  0xda   : > { %3861 = vmatmul.mubr.msk.f32.gmra.mrb[28].mxu1 %vm361_vm2, %v5242_v60  ;;  %4087 = vmatmul.mubr.msk.f32.gmra.mrb[12].mxu0 %vm361_vm2, %v5991_v2  ;;  %v5996_v60 = vld [vmem:[#allocation6_spill] sm:$0xff] }
  0xdb   : > { %3863 = vmatprep.mubr.msk.f32.mxu1 %vm361_vm2, %v5246_v33  ;;  %4089 = vmatprep.mubr.msk.f32.mxu0 %vm361_vm2, %v5992_v35  ;;  %v5997_v2 = vld [vmem:[#allocation26_spill] sm:$0xff]  ;;  %v6005_v33 = vld [vmem:[#allocation41_spill] sm:$0xff] }
  0xde   : > { %3864 = vmatmul.mubr.msk.f32.gmra.mrb[30].mxu1 %vm361_vm2, %v5262_v48  ;;  %4090 = vmatmul.mubr.msk.f32.gmra.mrb[14].mxu0 %vm361_vm2, %v5993_v44  ;;  %v5998_v48 = vld [vmem:[#allocation28_spill] sm:$0xff] }
  0xdf   : > { %3868 = vmatprep.mubr.msk.f32.mxu1 %vm361_vm2, %v5994_v34  ;;  %4092 = vmatprep.mubr.msk.f32.mxu0 %vm361_vm2, %v5995_v27  ;;  %v5999_v34 = vld [vmem:[#allocation30_spill] sm:$0xff] }
  0xe2   : > { %3869 = vmatmul.mubr.msk.f32.vlgmr.msra.gmra.mrb[0].mxu1 %vm361_vm2, %v5996_v60  ;;  %4093 = vmatmul.mubr.msk.f32.gmra.mrb[16].mxu0 %vm361_vm2, %v5997_v2  ;;  %v6000_v60 = vld [vmem:[#allocation32_spill] sm:$0xff] }
  0xe3   : > { %4167 = vmatpush3.msk.msra.mxu1 %vm426_vm0, %v4607_v1  ;;  %3871 = vmatprep.mubr.msk.f32.mxu1 %vm361_vm2, %v4654_v15  ;;  %v6001_v1 = vld [vmem:[#allocation34_spill] sm:$0xff]  ;;  %v6002_v15 = vld [vmem:[#allocation36_spill] sm:$0xff] }
  0xe4   : > { %4095 = vmatprep.mubr.msk.f32.mxu0 %vm361_vm2, %v5998_v48 }
  0xe6   : > { %3872 = vmatmul.mubr.msk.f32.gmra.mrb[2].mxu1 %vm361_vm2, %v4659_v18  ;;  %4096 = vmatmul.mubr.msk.f32.gmra.mrb[18].mxu0 %vm361_vm2, %v5999_v34  ;;  %v6003_v18 = vld [vmem:[#allocation38_spill] sm:$0xff] }
  0xe7   : > { %3874 = vmatprep.mubr.msk.f32.mxu1 %vm361_vm2, %v4671_v25  ;;  %4098 = vmatprep.mubr.msk.f32.mxu0 %vm361_vm2, %v6000_v60  ;;  %v6004_v25 = vld [vmem:[#allocation40_spill] sm:$0xff] }
  0xea   : > { %3875 = vmatmul.mubr.msk.f32.gmra.mrb[4].mxu1 %vm361_vm2, %v4674_v26  ;;  %4099 = vmatmul.mubr.msk.f32.gmra.mrb[20].mxu0 %vm361_vm2, %v6001_v1  ;;  %v1619_v26 = vrot.slane %v5230_v9, 1 }
  0xeb   : > { %3877 = vmatprep.mubr.msk.f32.mxu1 %vm361_vm2, %v4685_v31  ;;  %4101 = vmatprep.mubr.msk.f32.mxu0 %vm361_vm2, %v6002_v15  ;;  %v1620_v31 = vrot.slane %v5233_v6, 1 }
  0xed   : > { %v5551_v15 = vsel %vm280_vm1, %v1619_v26, %v1620_v31 }
  0xee   : > { %3878 = vmatmul.mubr.msk.f32.gmra.mrb[6].mxu1 %vm361_vm2, %v4688_v32  ;;  %4102 = vmatmul.mubr.msk.f32.gmra.mrb[22].mxu0 %vm361_vm2, %v6003_v18  ;;  %v6006_v32 = vld [vmem:[#allocation42_spill] sm:$0xff]  ;;  %v2425_v18 = vrot.slane %v5427_v62, 1 }
  0xef   : > { %3880 = vmatprep.mubr.msk.f32.mxu1 %vm361_vm2, %v4725_v42  ;;  %4104 = vmatprep.mubr.msk.f32.mxu0 %vm361_vm2, %v6004_v25  ;;  %v1622_v42 = vrot.slane %v5251_v52, 1  ;;  %v2424_v25 = vrot.slane %v5416_v38, 1  ;;  %v2427_v52 = vrot.slane %v5554_v36, 1 }
  0xf1   : > { %v2426_v26 = vsel %vm280_vm1, %v2424_v25, %v2425_v18 }
  0xf2   : > { %3881 = vmatmul.mubr.msk.f32.gmra.mrb[8].mxu1 %vm361_vm2, %v4728_v43  ;;  %4105 = vmatmul.mubr.msk.f32.gmra.mrb[24].mxu0 %vm361_vm2, %v6005_v33  ;;  %v6007_v43 = vld [vmem:[#allocation43_spill] sm:$0xff] }
  0xf3   : > { %3883 = vmatprep.mubr.msk.f32.mxu1 %vm361_vm2, %v4753_v50  ;;  %4107 = vmatprep.mubr.msk.f32.mxu0 %vm361_vm2, %v6006_v32  ;;  %v5565_v50 = vsel %vm280_vm1, %v1620_v31, %v1622_v42 }
  0xf6   : > { %3884 = vmatmul.mubr.msk.f32.gmra.mrb[10].mxu1 %vm361_vm2, %v4756_v51  ;;  %4108 = vmatmul.mubr.msk.f32.gmra.mrb[26].mxu0 %vm361_vm2, %v6007_v43  ;;  %v2428_v51 = vsel %vm280_vm1, %v2425_v18, %v2427_v52 }
  0xf7   : > { %3886 = vmatprep.mubr.msk.f32.mxu1 %vm361_vm2, %v4779_v58  ;;  %4110 = vmatprep.mubr.msk.f32.mxu0 %vm361_vm2, %v5551_v15  ;;  %v6011_v58 = vld [vmem:[#allocation36_spill] sm:$0xff] }
  0xfa   : > { %3887 = vmatmul.mubr.msk.f32.gmra.mrb[12].mxu1 %vm361_vm2, %v4782_v59  ;;  %4111 = vmatmul.mubr.msk.f32.gmra.mrb[28].mxu0 %vm361_vm2, %v5565_v50  ;;  %v6012_v59 = vld [vmem:[#allocation48_spill] sm:$0xff] }
  0xfb   : > { %3889 = vmatprep.mubr.msk.f32.mxu1 %vm361_vm2, %v4805_v3  ;;  %4113 = vmatprep.mubr.msk.f32.mxu0 %vm361_vm2, %v2426_v26  ;;  %v6013_v3 = vld [vmem:[#allocation38_spill] sm:$0xff] }
  0xfe   : > { %3890 = vmatmul.mubr.msk.f32.gmra.mrb[14].mxu1 %vm361_vm2, %v4808_v7  ;;  %4114 = vmatmul.mubr.msk.f32.gmra.mrb[30].mxu0 %vm361_vm2, %v2428_v51  ;;  %v6014_v7 = vld [vmem:[#allocation49_spill] sm:$0xff] }
  0xff   : > { %3892 = vmatprep.mubr.msk.f32.mxu1 %vm361_vm2, %v4846_v28  ;;  %4118 = vmatprep.mubr.msk.f32.mxu0 %vm361_vm2, %v4901_v21  ;;  %v2693_v28 = vrot.slane %v5416_v38, 2  ;;  %v2696_v21 = vrot.slane %v5554_v36, 2 }
 0x102   : > { %3893 = vmatmul.mubr.msk.f32.gmra.mrb[16].mxu1 %vm361_vm2, %v4849_v29  ;;  %4119 = vmatmul.mubr.msk.f32.vlgmr.msra.gmra.mrb[0].mxu0 %vm361_vm2, %v5968_v5  ;;  %v2694_v29 = vrot.slane %v5427_v62, 2 }
 0x103   : > { %3895 = vmatprep.mubr.msk.f32.mxu1 %vm361_vm2, %v4874_v53  ;;  %4121 = vmatprep.mubr.msk.f32.mxu0 %vm361_vm2, %v5969_v11  ;;  %v6017_v53 = vld [vmem:[#allocation51_spill] sm:$0xff] }
 0x106   : > { %3896 = vmatmul.mubr.msk.f32.gmra.mrb[18].mxu1 %vm361_vm2, %v4877_v55  ;;  %4122 = vmatmul.mubr.msk.f32.gmra.mrb[2].mxu0 %vm361_vm2, %v5970_v47  ;;  %v6018_v55 = vld [vmem:[#allocation52_spill] sm:$0xff] }
 0x107   : > { %3898 = vmatprep.mubr.msk.f32.mxu1 %vm361_vm2, %v4906_v22  ;;  %4124 = vmatprep.mubr.msk.f32.mxu0 %vm361_vm2, %v5971_v63  ;;  %v6016_v22 = vld [vmem:[#allocation50_spill] sm:$0xff] }
 0x10a   : > { %3899 = vmatmul.mubr.msk.f32.gmra.mrb[20].mxu1 %vm361_vm2, %v4909_v24  ;;  %4125 = vmatmul.mubr.msk.f32.gmra.mrb[4].mxu0 %vm361_vm2, %v5972_v23  ;;  %v2695_v24 = vsel %vm947_vm3, %v2693_v28, %v2694_v29 }
 0x10b   : > { %3901 = vmatprep.mubr.msk.f32.mxu1 %vm361_vm2, %v4948_v8  ;;  %4127 = vmatprep.mubr.msk.f32.mxu0 %vm361_vm2, %v5973_v57  ;;  %v6015_v8 = vld [vmem:[#allocation40_spill] sm:$0xff] }
 0x10e   : > { %3902 = vmatmul.mubr.msk.f32.gmra.mrb[22].mxu1 %vm361_vm2, %v4951_v10  ;;  %4128 = vmatmul.mubr.msk.f32.gmra.mrb[6].mxu0 %vm361_vm2, %v5974_v30  ;;  %v6019_v10 = vld [vmem:[#allocation53_spill] sm:$0xff] }
 0x10f   : > { %3904 = vmatprep.mubr.msk.f32.mxu1 %vm361_vm2, %v4985_v46  ;;  %4130 = vmatprep.mubr.msk.f32.mxu0 %vm361_vm2, %v5050_v19  ;;  %v6008_v46 = vld [vmem:[#allocation37_spill] sm:$0xff] }
 0x112   : > { %3905 = vmatmul.mubr.msk.f32.gmra.mrb[24].mxu1 %vm361_vm2, %v4988_v12  ;;  %4131 = vmatmul.mubr.msk.f32.gmra.mrb[8].mxu0 %vm361_vm2, %v5975_v37  ;;  %v2697_v12 = vsel %vm947_vm3, %v2694_v29, %v2696_v21 }
 0x113   : > { %3907 = vmatprep.mubr.msk.f32.mxu1 %vm361_vm2, %v5020_v20  ;;  %4133 = vmatprep.mubr.msk.f32.mxu0 %vm361_vm2, %v5085_v39 }
 0x116   : > { %3908 = vmatmul.mubr.msk.f32.gmra.mrb[26].mxu1 %vm361_vm2, %v5023_v54  ;;  %4134 = vmatmul.mubr.msk.f32.gmra.mrb[10].mxu0 %vm361_vm2, %v5102_v41 }
 0x117   : > { %3910 = vmatprep.mubr.msk.f32.mxu1 %vm361_vm2, %v5055_v40  ;;  %4136 = vmatprep.mubr.msk.f32.mxu0 %vm361_vm2, %v5109_v13 }
 0x11a   : > { %3911 = vmatmul.mubr.msk.f32.gmra.mrb[28].mxu1 %vm361_vm2, %v6008_v46  ;;  %4137 = vmatmul.mubr.msk.f32.gmra.mrb[12].mxu0 %vm361_vm2, %v5125_v17 }
 0x11b   : > { %3913 = vmatprep.mubr.msk.f32.mxu1 %vm361_vm2, %v5230_v9  ;;  %4139 = vmatprep.mubr.msk.f32.mxu0 %vm361_vm2, %v5129_v61  ;;  %v6009_v9 = vld [vmem:[#allocation44_spill] sm:$0xff] }
 0x11e   : > { %3914 = vmatmul.mubr.msk.f32.gmra.mrb[30].mxu1 %vm361_vm2, %v5233_v6  ;;  %4140 = vmatmul.mubr.msk.f32.gmra.mrb[14].mxu0 %vm361_vm2, %v5142_v45  ;;  %v6010_v6 = vld [vmem:[#allocation47_spill] sm:$0xff] }
 0x11f   : > { %3942 = vmatprep.mubr.msk.f32.mxu1 %vm361_vm2, %v5992_v35  ;;  %4142 = vmatprep.mubr.msk.f32.mxu0 %vm361_vm2, %v5146_v0 }
 0x122   : > { %3943 = vmatmul.mubr.msk.f32.vlgmr.msra.gmra.mrb[16].mxu1 %vm361_vm2, %v5993_v44  ;;  %4143 = vmatmul.mubr.msk.f32.gmra.mrb[16].mxu0 %vm361_vm2, %v5166_v16 }
 0x123   : > { %3945 = vmatprep.mubr.msk.f32.mxu1 %vm361_vm2, %v5995_v27  ;;  %4145 = vmatprep.mubr.msk.f32.mxu0 %vm361_vm2, %v6009_v9 }
 0x126   : > { %3946 = vmatmul.mubr.msk.f32.gmra.mrb[18].mxu1 %vm361_vm2, %v5997_v2  ;;  %4146 = vmatmul.mubr.msk.f32.gmra.mrb[18].mxu0 %vm361_vm2, %v5185_v56 }
 0x127   : > { %3948 = vmatprep.mubr.msk.f32.mxu1 %vm361_vm2, %v5998_v48  ;;  %4148 = vmatprep.mubr.msk.f32.mxu0 %vm361_vm2, %v5189_v14  ;;  %v5719_v48 = vld [vmem:[%s5842_s2] ss:$0 sm:$0xff] }
 0x12a   : > { %3949 = vmatmul.mubr.msk.f32.gmra.mrb[20].mxu1 %vm361_vm2, %v5999_v34  ;;  %4149 = vmatmul.mubr.msk.f32.gmra.mrb[20].mxu0 %vm361_vm2, %v5985_v4 }
 0x12b   : > { %3951 = vmatprep.mubr.msk.f32.mxu1 %vm361_vm2, %v6000_v60  ;;  %4151 = vmatprep.mubr.msk.f32.mxu0 %vm361_vm2, %v5987_v49 }
 0x12e   : > { %3952 = vmatmul.mubr.msk.f32.gmra.mrb[22].mxu1 %vm361_vm2, %v6001_v1  ;;  %4152 = vmatmul.mubr.msk.f32.gmra.mrb[22].mxu0 %vm361_vm2, %v6010_v6 }
 0x12f   : > { %3954 = vmatprep.mubr.msk.f32.mxu1 %vm361_vm2, %v6011_v58  ;;  %4154 = vmatprep.mubr.msk.f32.mxu0 %vm361_vm2, %v6012_v59 }
 0x132   : > { %3955 = vmatmul.mubr.msk.f32.gmra.mrb[24].mxu1 %vm361_vm2, %v6013_v3  ;;  %4155 = vmatmul.mubr.msk.f32.gmra.mrb[24].mxu0 %vm361_vm2, %v6014_v7 }
 0x133   : > { %3957 = vmatprep.mubr.msk.f32.mxu1 %vm361_vm2, %v6015_v8  ;;  %4157 = vmatprep.mubr.msk.f32.mxu0 %vm361_vm2, %v6016_v22 }
 0x136   : > { %3958 = vmatmul.mubr.msk.f32.gmra.mrb[26].mxu1 %vm361_vm2, %v6005_v33  ;;  %4158 = vmatmul.mubr.msk.f32.gmra.mrb[26].mxu0 %vm361_vm2, %v6017_v53 }
 0x137   : > { %3960 = vmatprep.mubr.msk.f32.mxu1 %vm361_vm2, %v6006_v32  ;;  %4160 = vmatprep.mubr.msk.f32.mxu0 %vm361_vm2, %v6018_v55 }
 0x13a   : > { %3961 = vmatmul.mubr.msk.f32.gmra.mrb[28].mxu1 %vm361_vm2, %v6007_v43  ;;  %4161 = vmatmul.mubr.msk.f32.gmra.mrb[28].mxu0 %vm361_vm2, %v6019_v10 }
 0x13b   : > { %3963 = vmatprep.mubr.msk.f32.mxu1 %vm361_vm2, %v5551_v15  ;;  %4163 = vmatprep.mubr.msk.f32.mxu0 %vm361_vm2, %v2695_v24 }
 0x13e   : > { %3964 = vmatmul.mubr.msk.f32.gmra.mrb[30].mxu1 %vm361_vm2, %v5565_v50  ;;  %4164 = vmatmul.mubr.msk.f32.gmra.mrb[30].mxu0 %vm361_vm2, %v2697_v12 }
 0x1b5   : > { %v3870_v40 = vpop.f32.mrb[0].mxu1 }
 0x1b6   : > { %v1427_v20 = vpop.f32.mrb[1].mxu1 }
 0x1b9   : > { %v3873_v54 = vpop.f32.mrb[2].mxu1 }
 0x1ba   : > { %v1437_v19 = vpop.f32.mrb[3].mxu1 }
 0x1bd   : > { %v3876_v13 = vpop.f32.mrb[4].mxu1 }
 0x1be   : > { %v1447_v39 = vpop.f32.mrb[5].mxu1 }
 0x1c1   : > { %v3879_v41 = vpop.f32.mrb[6].mxu1 }
 0x1c2   : > { %v1457_v17 = vpop.f32.mrb[7].mxu1 }
 0x1c5   : > { %v3882_v61 = vpop.f32.mrb[8].mxu1 }
 0x1c6   : > { %v1467_v45 = vpop.f32.mrb[9].mxu1 }
 0x1c9   : > { %v3885_v0 = vpop.f32.mrb[10].mxu1 }
 0x1ca   : > { %v1477_v16 = vpop.f32.mrb[11].mxu1 }
 0x1cd   : > { %v3888_v49 = vpop.f32.mrb[12].mxu1 }
 0x1ce   : > { %v1487_v56 = vpop.f32.mrb[13].mxu1 }
 0x1d1   : > { %v3891_v14 = vpop.f32.mrb[14].mxu1 }
 0x1d2   : > { %v5711_v36 = vpop.f32.mrb[15].mxu1 }
 0x1d5   : > { %v4120_v33 = vpop.f32.mrb[0].mxu0 }
 0x1d6   : > { %v4168_v5 = vadd.f32 %v4120_v33, %v3870_v40  ;;  %v2771_v11 = vpop.f32.mrb[1].mxu0 }
 0x1d7   : > { %v4169_v47 = vadd.f32 %v2771_v11, %v1427_v20 }
 0x1d8   : > { %v2970_v63 = vadd.f32 %v4168_v5, %v5719_v48 }
 0x1d9   : > { %v2969_v23 = vadd.f32 %v4169_v47, %v5719_v48  ;;  %v4123_v57 = vpop.f32.mrb[2].mxu0 }
 0x1da   : > { %3002 = vst [vmem:[%s5723_s6 + $0x8] sm:$0xff] %v2970_v63  ;;  %v4170_v30 = vadd.f32 %v4123_v57, %v3873_v54  ;;  %v2781_v38 = vpop.f32.mrb[3].mxu0 }
 0x1db   : > { %3001 = vst [vmem:[%s5723_s6] sm:$0xff] %v2969_v23  ;;  %v4171_v37 = vadd.f32 %v2781_v38, %v1437_v19 }
 0x1dc   : > { %v2972_v62 = vadd.f32 %v4170_v30, %v5719_v48 }
 0x1dd   : > { %v2971_v4 = vadd.f32 %v4171_v37, %v5719_v48  ;;  %v4126_v35 = vpop.f32.mrb[4].mxu0 }
 0x1de   : > { %3004 = vst [vmem:[%s5723_s6 + $0x18] sm:$0xff] %v2972_v62  ;;  %v4172_v44 = vadd.f32 %v4126_v35, %v3876_v13  ;;  %v2791_v27 = vpop.f32.mrb[5].mxu0 }
 0x1df   : > { %3003 = vst [vmem:[%s5723_s6 + $0x10] sm:$0xff] %v2971_v4  ;;  %v4173_v2 = vadd.f32 %v2791_v27, %v1447_v39 }
 0x1e0   : > { %v2974_v34 = vadd.f32 %v4172_v44, %v5719_v48 }
 0x1e1   : > { %v2973_v60 = vadd.f32 %v4173_v2, %v5719_v48  ;;  %v4129_v1 = vpop.f32.mrb[6].mxu0 }
 0x1e2   : > { %3006 = vst [vmem:[%s5723_s6 + $0x28] sm:$0xff] %v2974_v34  ;;  %v4174_v15 = vadd.f32 %v4129_v1, %v3879_v41  ;;  %v2801_v18 = vpop.f32.mrb[7].mxu0 }
 0x1e3   : > { %3005 = vst [vmem:[%s5723_s6 + $0x20] sm:$0xff] %v2973_v60  ;;  %v4175_v25 = vadd.f32 %v2801_v18, %v1457_v17 }
 0x1e4   : > { %v2976_v31 = vadd.f32 %v4174_v15, %v5719_v48 }
 0x1e5   : > { %v2975_v32 = vadd.f32 %v4175_v25, %v5719_v48  ;;  %v4132_v42 = vpop.f32.mrb[8].mxu0 }
 0x1e6   : > { %3008 = vst [vmem:[%s5723_s6 + $0x38] sm:$0xff] %v2976_v31  ;;  %v4176_v43 = vadd.f32 %v4132_v42, %v3882_v61  ;;  %v2811_v50 = vpop.f32.mrb[9].mxu0 }
 0x1e7   : > { %3007 = vst [vmem:[%s5723_s6 + $0x30] sm:$0xff] %v2975_v32  ;;  %v4177_v52 = vadd.f32 %v2811_v50, %v1467_v45 }
 0x1e8   : > { %v2978_v26 = vadd.f32 %v4176_v43, %v5719_v48 }
 0x1e9   : > { %v2977_v51 = vadd.f32 %v4177_v52, %v5719_v48  ;;  %v4135_v46 = vpop.f32.mrb[10].mxu0 }
 0x1ea   : > { %3010 = vst [vmem:[%s5723_s6 + $0x48] sm:$0xff] %v2978_v26  ;;  %v4178_v9 = vadd.f32 %v4135_v46, %v3885_v0  ;;  %v2821_v6 = vpop.f32.mrb[11].mxu0 }
 0x1eb   : > { %3009 = vst [vmem:[%s5723_s6 + $0x40] sm:$0xff] %v2977_v51  ;;  %v4179_v58 = vadd.f32 %v2821_v6, %v1477_v16 }
 0x1ec   : > { %v2980_v59 = vadd.f32 %v4178_v9, %v5719_v48 }
 0x1ed   : > { %v2979_v3 = vadd.f32 %v4179_v58, %v5719_v48  ;;  %v4138_v7 = vpop.f32.mrb[12].mxu0 }
 0x1ee   : > { %3012 = vst [vmem:[%s5723_s6 + $0x58] sm:$0xff] %v2980_v59  ;;  %v4180_v8 = vadd.f32 %v4138_v7, %v3888_v49  ;;  %v2831_v22 = vpop.f32.mrb[13].mxu0 }
 0x1ef   : > { %3011 = vst [vmem:[%s5723_s6 + $0x50] sm:$0xff] %v2979_v3  ;;  %v4181_v28 = vadd.f32 %v2831_v22, %v1487_v56 }
 0x1f0   : > { %v2982_v29 = vadd.f32 %v4180_v8, %v5719_v48 }
 0x1f1   : > { %v2981_v53 = vadd.f32 %v4181_v28, %v5719_v48  ;;  %v4141_v55 = vpop.f32.mrb[14].mxu0 }
 0x1f2   : > { %3014 = vst [vmem:[%s5723_s6 + $0x68] sm:$0xff] %v2982_v29  ;;  %v4182_v21 = vadd.f32 %v4141_v55, %v3891_v14  ;;  %v2841_v24 = vpop.f32.mrb[15].mxu0 }
 0x1f3   : > { %3013 = vst [vmem:[%s5723_s6 + $0x60] sm:$0xff] %v2981_v53  ;;  %v4183_v10 = vadd.f32 %v2841_v24, %v5711_v36 }
 0x1f4   : > { %v2984_v12 = vadd.f32 %v4182_v21, %v5719_v48 }
 0x1f5   : > { %v3944_v40 = vpop.f32.mrb[16].mxu1  ;;  %v2983_v20 = vadd.f32 %v4183_v10, %v5719_v48  ;;  %v4144_v54 = vpop.f32.mrb[16].mxu0 }
 0x1f6   : > { %v1777_v19 = vpop.f32.mrb[17].mxu1  ;;  %3016 = vst [vmem:[%s5723_s6 + $0x78] sm:$0xff] %v2984_v12  ;;  %v4184_v13 = vadd.f32 %v4144_v54, %v3944_v40  ;;  %v2851_v39 = vpop.f32.mrb[17].mxu0 }
 0x1f7   : > { %3015 = vst [vmem:[%s5723_s6 + $0x70] sm:$0xff] %v2983_v20  ;;  %v4185_v41 = vadd.f32 %v2851_v39, %v1777_v19 }
 0x1f8   : > { %v2986_v17 = vadd.f32 %v4184_v13, %v5719_v48 }
 0x1f9   : > { %v3947_v61 = vpop.f32.mrb[18].mxu1  ;;  %v2985_v45 = vadd.f32 %v4185_v41, %v5719_v48  ;;  %v4147_v0 = vpop.f32.mrb[18].mxu0 }
 0x1fa   : > { %v1787_v16 = vpop.f32.mrb[19].mxu1  ;;  %3018 = vst [vmem:[%s5723_s6 + $0x88] sm:$0xff] %v2986_v17  ;;  %v4186_v49 = vadd.f32 %v4147_v0, %v3947_v61  ;;  %v2861_v56 = vpop.f32.mrb[19].mxu0 }
 0x1fb   : > { %3017 = vst [vmem:[%s5723_s6 + $0x80] sm:$0xff] %v2985_v45  ;;  %v4187_v14 = vadd.f32 %v2861_v56, %v1787_v16 }
 0x1fc   : > { %v2988_v36 = vadd.f32 %v4186_v49, %v5719_v48 }
 0x1fd   : > { %v3950_v33 = vpop.f32.mrb[20].mxu1  ;;  %v2987_v5 = vadd.f32 %v4187_v14, %v5719_v48  ;;  %v4150_v11 = vpop.f32.mrb[20].mxu0 }
 0x1fe   : > { %v1797_v47 = vpop.f32.mrb[21].mxu1  ;;  %3020 = vst [vmem:[%s5723_s6 + $0x98] sm:$0xff] %v2988_v36  ;;  %v4188_v63 = vadd.f32 %v4150_v11, %v3950_v33  ;;  %v2871_v23 = vpop.f32.mrb[21].mxu0 }
 0x1ff   : > { %3019 = vst [vmem:[%s5723_s6 + $0x90] sm:$0xff] %v2987_v5  ;;  %v4189_v57 = vadd.f32 %v2871_v23, %v1797_v47 }
 0x200   : > { %v2990_v30 = vadd.f32 %v4188_v63, %v5719_v48 }
 0x201   : > { %v3953_v38 = vpop.f32.mrb[22].mxu1  ;;  %v2989_v37 = vadd.f32 %v4189_v57, %v5719_v48  ;;  %v4153_v62 = vpop.f32.mrb[22].mxu0 }
 0x202   : > { %v1807_v4 = vpop.f32.mrb[23].mxu1  ;;  %3022 = vst [vmem:[%s5723_s6 + $0xa8] sm:$0xff] %v2990_v30  ;;  %v4190_v35 = vadd.f32 %v4153_v62, %v3953_v38  ;;  %v2881_v44 = vpop.f32.mrb[23].mxu0 }
 0x203   : > { %3021 = vst [vmem:[%s5723_s6 + $0xa0] sm:$0xff] %v2989_v37  ;;  %v4191_v27 = vadd.f32 %v2881_v44, %v1807_v4 }
 0x204   : > { %v2992_v2 = vadd.f32 %v4190_v35, %v5719_v48 }
 0x205   : > { %v3956_v34 = vpop.f32.mrb[24].mxu1  ;;  %v2991_v60 = vadd.f32 %v4191_v27, %v5719_v48  ;;  %v4156_v1 = vpop.f32.mrb[24].mxu0 }
 0x206   : > { %v1817_v15 = vpop.f32.mrb[25].mxu1  ;;  %3024 = vst [vmem:[%s5723_s6 + $0xb8] sm:$0xff] %v2992_v2  ;;  %v4192_v18 = vadd.f32 %v4156_v1, %v3956_v34  ;;  %v2891_v25 = vpop.f32.mrb[25].mxu0 }
 0x207   : > { %3023 = vst [vmem:[%s5723_s6 + $0xb0] sm:$0xff] %v2991_v60  ;;  %v4193_v31 = vadd.f32 %v2891_v25, %v1817_v15 }
 0x208   : > { %v2994_v32 = vadd.f32 %v4192_v18, %v5719_v48 }
 0x209   : > { %v3959_v42 = vpop.f32.mrb[26].mxu1  ;;  %v2993_v43 = vadd.f32 %v4193_v31, %v5719_v48  ;;  %v4159_v50 = vpop.f32.mrb[26].mxu0 }
 0x20a   : > { %v1827_v52 = vpop.f32.mrb[27].mxu1  ;;  %3026 = vst [vmem:[%s5723_s6 + $0xc8] sm:$0xff] %v2994_v32  ;;  %v4194_v26 = vadd.f32 %v4159_v50, %v3959_v42  ;;  %v2901_v51 = vpop.f32.mrb[27].mxu0 }
 0x20b   : > { %3025 = vst [vmem:[%s5723_s6 + $0xc0] sm:$0xff] %v2993_v43  ;;  %v4195_v46 = vadd.f32 %v2901_v51, %v1827_v52 }
 0x20c   : > { %v2996_v9 = vadd.f32 %v4194_v26, %v5719_v48 }
 0x20d   : > { %v3962_v6 = vpop.f32.mrb[28].mxu1  ;;  %v2995_v58 = vadd.f32 %v4195_v46, %v5719_v48  ;;  %v4162_v59 = vpop.f32.mrb[28].mxu0 }
 0x20e   : > { %v1837_v3 = vpop.f32.mrb[29].mxu1  ;;  %3028 = vst [vmem:[%s5723_s6 + $0xd8] sm:$0xff] %v2996_v9  ;;  %v4196_v7 = vadd.f32 %v4162_v59, %v3962_v6  ;;  %v2911_v8 = vpop.f32.mrb[29].mxu0 }
 0x20f   : > { %3027 = vst [vmem:[%s5723_s6 + $0xd0] sm:$0xff] %v2995_v58  ;;  %v4197_v22 = vadd.f32 %v2911_v8, %v1837_v3 }
 0x210   : > { %v2998_v28 = vadd.f32 %v4196_v7, %v5719_v48 }
 0x211   : > { %v3965_v29 = vpop.f32.mrb[30].mxu1  ;;  %v2997_v53 = vadd.f32 %v4197_v22, %v5719_v48  ;;  %v4165_v55 = vpop.f32.mrb[30].mxu0 }
 0x212   : > { %v1847_v21 = vpop.f32.mrb[31].mxu1  ;;  %3030 = vst [vmem:[%s5723_s6 + $0xe8] sm:$0xff] %v2998_v28  ;;  %v4198_v24 = vadd.f32 %v4165_v55, %v3965_v29  ;;  %v2921_v10 = vpop.f32.mrb[31].mxu0 }
 0x213   : > { %3029 = vst [vmem:[%s5723_s6 + $0xe0] sm:$0xff] %v2997_v53  ;;  %v4199_v12 = vadd.f32 %v2921_v10, %v1847_v21 }
 0x214   : > { %v3000_v40 = vadd.f32 %v4198_v24, %v5719_v48 }
 0x215   : > { %v2999_v20 = vadd.f32 %v4199_v12, %v5719_v48 }
 0x216   : > { %3032 = vst [vmem:[%s5723_s6 + $0xf8] sm:$0xff] %v3000_v40 }
 0x217   : > { %3031 = vst [vmem:[%s5723_s6 + $0xf0] sm:$0xff] %v2999_v20 }
 0x218   : > { %4479 = shalt.err (!%p4476_p3)
}
 0x219   : > { %s4480_s25 = scalar_lea.hbm %s5790_s11, 4096  ;;  %s4484_s28 = scalar_lea.hbm %s5843_s3, 8192 }
 0x21a   : > { %p4481_p4 = scmp.ne.s32.totalorder %s5790_s11, %s4480_s25  ;;  %p4485_p9 = scmp.lt.u32.totalorder %s5790_s11, %s5843_s3 }
 0x21b   : > { %p4486_p10 = scmp.lt.u32.totalorder %s4484_s28, %s4480_s25  ;;  %p4488_p12 = scmp.lt.u32.totalorder %s4480_s25, %s5790_s11 }
 0x21c   : > { %p4482_p7 = pnand %p4481_p4, %p4591_p5 }
 0x21d   : > { %p4487_p11 = por %p4486_p10, %p4485_p9 }
 0x21e   : > { %p4483_p8 = pneg %p4482_p7 }
 0x21f   : > { %p4489_p13 = por %p4488_p12, %p4487_p11 }
 0x221   : > { %p4490_p0 = pnand %p4489_p13, %p4483_p8 }
 0x223   : > { %4493 = shalt.err (!%p4490_p0)
}
 0x224   : > { %s4531_s4 = smov 128   ;;  %s4532_s5 = smov 8  }
 0x225   : > { %4425 = dma.vmem_to_hbm [thread:$0]  (%p4591_p5), %s5792_s8, 4096, %s5790_s11, %s5799_s16, %s4531_s4, %s4531_s4, %s4532_s5  }
 0x226 PF: > { %p4431_p1 = scmp.ge.s32.totalorder %s4528_s15, 2  ;;  %s3062_s6 = sand.u32 1, %s4516_s12  }
 0x227   : > { %s3063_s7 = scalar_lea.sflag [#allocation3], %s3062_s6 }
 0x228   : > { %p4428_p2 = pnand %p4431_p1, %p4595_p6 }
 0x22a   : > { %4511 = dma.done.wait (!%p4428_p2), %s3063_s7, 4096  }
 0x22b   : > { %4513 = vsyncadd (!%p4428_p2), %s3063_s7, 4294963200  ;;  %p13_p3 = scmp.ge.s32.totalorder %s4578_s18, 4   ;;  %s6020_s12 = smov %s4520_s13 }
 0x22c   : > { %s6021_s13 = smov %s4524_s14  ;;  %s6022_s14 = smov %s4589_s21 }
 0x22d   : > { %s6023_s15 = smov %s4578_s18  ;;  %15 = sbr.rel (!%p13_p3) target bundleno = 3 (0x3), region = 67 }
 0x234   :  { %3068 = vsyncpa [#allocation3], 1 }
 0x235   :  { %3070 = vsyncpa [#allocation3 + $0x1], 1 }

</bundles_post_ra>
